<compile_context>
chip_gen: v7x
topology: tpu7x:2x2x1
jax: 0.10.0
libtpu: 0.0.40
codegen_flags: <defaults>
</compile_context>

<pallas_src>
import math
from functools import partial

import jax
import jax.numpy as jnp
from jax.experimental import pallas as pl
from jax.experimental.pallas import tpu as pltpu


# ----------------------------- Config ---------------------------------------
class Config:
    n_embd = 32
    n_head = 4
    n_query_groups = 2          # GQA: exercises repeat_interleave path
    head_size = 8               # n_head * head_size == n_embd
    n_layer = 2
    intermediate_size = 64
    padded_vocab_size = 128
    block_size = 16
    max_position_embeddings = 16
    norm_eps = 1e-5
    bias = False
    parallel_residual = False
    shared_attention_norm = False
    attn_pdrop = 0.0
    resid_pdrop = 0.0
    embd_pdrop = 0.0
    positional_embedding = "absolute"


CFG = Config()
B, T = 2, 8   # batch, sequence length (T <= block_size)


# --------------------------- in-kernel helpers -------------------------------
def _rmsnorm(x, w, eps):
    # lit_gpt RMSNorm: weight * (x * rsqrt(mean(x^2) + eps)); all f32 (v5e: no bf16 VPU/EUP).
    ms = jnp.mean(x * x, axis=-1, keepdims=True)
    return x * jax.lax.rsqrt(ms + eps) * w


# --------------------------- fused forward kernel ----------------------------
def fused_forward_kernel(x_ref, bias_ref, wqkv_ref, wproj_ref, n1w_ref, n2w_ref,
                         w12_ref, w3_ref, lnf_ref, wlm_ref,
                         logits_ref, hid_ref, *, cfg, batch, seq):
    """Entire forward: n_layer x (RMSNorm -> fused GQA causal attn -> +res -> RMSNorm -> SwiGLU
    -> +res) followed by final RMSNorm + lm_head. Hidden state never leaves the chip between
    layers; weights are bf16 VMEM-resident (fits easily at this size)."""
    nh, ng, hs = cfg.n_head, cfg.n_query_groups, cfg.head_size
    inter = cfg.intermediate_size
    eps = cfg.norm_eps
    bt = batch * seq
    QW, KW = nh * hs, ng * hs
    bf16 = jnp.bfloat16

    bias = bias_ref[...]        # (nh*BT, ng*BT) widened causal/batch/group mask (0 / -1e30), f32
    x = x_ref[...]              # (BT, C) f32

    for l in range(cfg.n_layer):            # n_layer static & small
        # ---- attention: ONE score matmul + ONE PV matmul for all heads/groups ----
        n1 = _rmsnorm(x, n1w_ref[l], eps)
        qkv = jnp.dot(n1.astype(bf16), wqkv_ref[l],
                      preferred_element_type=jnp.float32)             # (BT, nh*hs + 2*ng*hs)
        # Row-stack query heads (head-major) and KV groups; 1/sqrt(hs) already folded into Wq.
        q_rows = jnp.concatenate([qkv[:, h * hs:(h + 1) * hs] for h in range(nh)], axis=0)
        k_rows = jnp.concatenate([qkv[:, QW + g * hs:QW + (g + 1) * hs]
                                  for g in range(ng)], axis=0)
        v_rows = jnp.concatenate([qkv[:, QW + KW + g * hs:QW + KW + (g + 1) * hs]
                                  for g in range(ng)], axis=0)
        s = jax.lax.dot_general(q_rows.astype(bf16), k_rows.astype(bf16),
                                (((1,), (1,)), ((), ())),
                                preferred_element_type=jnp.float32)    # (nh*BT, ng*BT)
        s = s + bias                                                   # f32 bias / masking
        m = jnp.max(s, axis=-1, keepdims=True)
        p = jnp.exp(s - m)
        p = p * pl.reciprocal(jnp.sum(p, axis=-1, keepdims=True), approx=True)
        y_rows = jnp.dot(p.astype(bf16), v_rows.astype(bf16),
                         preferred_element_type=jnp.float32)           # (nh*BT, hs)
        # Re-pack head rows to lanes in head order (matches wproj row order).
        y = jnp.concatenate([y_rows[h * bt:(h + 1) * bt, :] for h in range(nh)], axis=1)
        h_att = jnp.dot(y.astype(bf16), wproj_ref[l], preferred_element_type=jnp.float32)

        # ---- non-parallel residual + SwiGLU MLP (w1||w2 fused; lane-dense 2I = 128) ----
        x = x + h_att
        n2 = _rmsnorm(x, n2w_ref[l], eps)
        g12 = jnp.dot(n2.astype(bf16), w12_ref[l], preferred_element_type=jnp.float32)
        gate = jax.nn.silu(g12[:, :inter]) * g12[:, inter:]            # f32 elementwise
        x = x + jnp.dot(gate.astype(bf16), w3_ref[l], preferred_element_type=jnp.float32)
        hid_ref[l] = x           # per-layer hidden (all_hiddens); 32-lane store, tolerable at C=32

    # ---- final RMSNorm + lm_head (V = 128, lane-dense output) ----
    xn = _rmsnorm(x, lnf_ref[...], eps)
    logits_ref[...] = jnp.dot(xn.astype(bf16), wlm_ref[...], preferred_element_type=jnp.float32)


def fused_forward_call(x2d, state, cfg, batch, seq):
    BT, C = x2d.shape
    V = cfg.padded_vocab_size
    args = (x2d, state["attn_bias"], state["wqkv"], state["wproj"], state["n1w"],
            state["n2w"], state["w12"], state["w3"], state["ln_f_w"], state["lm_head_w"])
    in_specs = [pl.BlockSpec(a.shape, lambda i, n=a.ndim: (0,) * n) for a in args]
    out_shapes = (jax.ShapeDtypeStruct((BT, V), jnp.float32),
                  jax.ShapeDtypeStruct((cfg.n_layer, BT, C), jnp.float32))
    out_specs = (pl.BlockSpec((BT, V), lambda i: (0, 0)),
                 pl.BlockSpec((cfg.n_layer, BT, C), lambda i: (0, 0, 0)))
    return pl.pallas_call(
        partial(fused_forward_kernel, cfg=cfg, batch=batch, seq=seq),
        out_shape=out_shapes,
        grid=(1,),
        in_specs=in_specs,
        out_specs=out_specs,
        compiler_params=pltpu.CompilerParams(dimension_semantics=("arbitrary",)),
    )(*args)


# --------------------------- one-time preparation ----------------------------
def build_pos_cache(cfg):
    inv_freq = 1.0 / (10000.0 ** (jnp.arange(0, cfg.n_embd, 2, dtype=jnp.float32) / cfg.n_embd))
    t = jnp.arange(cfg.max_position_embeddings, dtype=jnp.float32)
    sinusoid = jnp.einsum("i,j->ij", t, inv_freq)
    embed = jnp.concatenate([jnp.sin(sinusoid), jnp.cos(sinusoid)], axis=-1)
    return embed.astype(jnp.bfloat16)   # build_pos_cache returns bf16 by default


def init_params(key, cfg):
    keys = iter(jax.random.split(key, 2 + 6 * cfg.n_layer))
    std_c = math.sqrt(2.0 / 5 / cfg.n_embd)
    std_i = 1.0 / math.sqrt(cfg.n_embd) / cfg.n_layer   # w3-style init
    qkv_dim = (cfg.n_head + 2 * cfg.n_query_groups) * cfg.head_size

    params = {
        "wte": jax.random.normal(next(keys), (cfg.padded_vocab_size, cfg.n_embd), jnp.float32) * std_c,
        "lm_head_w": jax.random.normal(next(keys), (cfg.n_embd, cfg.padded_vocab_size), jnp.float32) * std_c,
        "ln_f_w": jnp.ones((1, cfg.n_embd), jnp.float32),
        "pos_cache": build_pos_cache(cfg),
        "layers": [],
    }
    for _ in range(cfg.n_layer):
        layer = {
            "wqkv": jax.random.normal(next(keys), (cfg.n_embd, qkv_dim), jnp.float32) * std_c,
            "wproj": jax.random.normal(next(keys), (cfg.n_embd, cfg.n_embd), jnp.float32) * std_c,
            "n1w": jnp.ones((1, cfg.n_embd), jnp.float32),
            "n2w": jnp.ones((1, cfg.n_embd), jnp.float32),
            "w1": jax.random.normal(next(keys), (cfg.n_embd, cfg.intermediate_size), jnp.float32) * std_c,
            "w2": jax.random.normal(next(keys), (cfg.n_embd, cfg.intermediate_size), jnp.float32) * std_c,
            "w3": jax.random.normal(next(keys), (cfg.intermediate_size, cfg.n_embd), jnp.float32) * std_i,
        }
        params["layers"].append(layer)
    return params


def build_attn_bias(cfg, batch, seq):
    """Widened bias (nh*B*T, ng*B*T), f32: 0 where the column's KV group matches the row's head
    group AND same batch AND causal; -1e30 elsewhere. Rows are head-major row-stacked queries,
    columns are group-major row-stacked keys. Built ONCE at init."""
    nh, ng = cfg.n_head, cfg.n_query_groups
    qpkv = nh // ng
    bt = batch * seq
    r = jnp.arange(nh * bt)
    c = jnp.arange(ng * bt)
    r_head, r_pos = r // bt, r % bt
    c_grp, c_pos = c // bt, c % bt
    same_grp = (r_head[:, None] // qpkv) == c_grp[None, :]
    same_b = (r_pos[:, None] // seq) == (c_pos[None, :] // seq)
    causal = (c_pos[None, :] % seq) <= (r_pos[:, None] % seq)
    return jnp.where(same_grp & same_b & causal, 0.0, -1e30).astype(jnp.float32)


def prepare_state(params, cfg, batch, seq):
    """One-time (init-time): stack per-layer weights along n_layer, re-pack wqkv columns to
    [Q heads (head-major) | K groups | V groups], fold 1/sqrt(head_size) into the Q columns,
    fuse w1||w2, cast matmul weights to bf16 and build the widened attention bias. Keeping all
    of this out of the per-call path is the biggest wall-clock win at BT=16 (launch-bound)."""
    nh, ng, hs, C = cfg.n_head, cfg.n_query_groups, cfg.head_size, cfg.n_embd
    qpkv = nh // ng
    tot = qpkv + 2
    scale = 1.0 / math.sqrt(hs)

    def repack_wqkv(w):
        w4 = w.reshape(C, ng, tot, hs)
        wq = (w4[:, :, :qpkv, :] * scale).reshape(C, nh * hs)   # head h = g*qpkv + loc
        wk = w4[:, :, qpkv, :].reshape(C, ng * hs)
        wv = w4[:, :, qpkv + 1, :].reshape(C, ng * hs)
        return jnp.concatenate([wq, wk, wv], axis=1)

    layers = params["layers"]
    return {
        "wte": params["wte"],
        "pos_cache": params["pos_cache"],
        "attn_bias": build_attn_bias(cfg, batch, seq),
        "wqkv": jnp.stack([repack_wqkv(lp["wqkv"]) for lp in layers]).astype(jnp.bfloat16),
        "wproj": jnp.stack([lp["wproj"] for lp in layers]).astype(jnp.bfloat16),
        "n1w": jnp.stack([lp["n1w"] for lp in layers]),
        "n2w": jnp.stack([lp["n2w"] for lp in layers]),
        "w12": jnp.stack([jnp.concatenate([lp["w1"], lp["w2"]], axis=1)
                          for lp in layers]).astype(jnp.bfloat16),
        "w3": jnp.stack([lp["w3"] for lp in layers]).astype(jnp.bfloat16),
        "ln_f_w": params["ln_f_w"],
        "lm_head_w": params["lm_head_w"].astype(jnp.bfloat16),
    }


# --------------------------- jitted forward ----------------------------------
def make_forward(cfg, batch, seq):
    @jax.jit
    def fwd(idx, state):
        max_seq_length = cfg.block_size
        # token embedding + absolute sinusoidal positional embedding (embd_pdrop == 0)
        x = state["wte"][idx]                                        # (B, T, C) f32
        pos_ids = jnp.arange(max_seq_length)[None, :]
        pos = state["pos_cache"][pos_ids][:, :seq, :]                # (1, T, C) bf16
        x = x + pos.astype(jnp.float32)
        x2d = x.reshape(batch * seq, cfg.n_embd)
        logits2d, hid = fused_forward_call(x2d, state, cfg, batch, seq)
        logits = logits2d.reshape(batch, seq, cfg.padded_vocab_size)
        hiddens = hid.reshape(cfg.n_layer, batch, seq, cfg.n_embd)
        return logits, x, hiddens
    return fwd


def gpt_forward(idx, state, forward_fn, cfg):
    """GPTpos.forward(idx) with max_seq_length=None, input_pos=None, output_attention=False."""
    logits, x0, hid = forward_fn(idx, state)
    all_attns = [None] * cfg.n_layer                     # output_attention=False -> attns is None
    all_hiddens = [x0] + [hid[l] for l in range(cfg.n_layer)]
    return logits, all_attns, all_hiddens


# --------------------------- pure-JAX reference ------------------------------
def ref_forward(idx, params, cfg, batch, seq):
    nh, ng, hs = cfg.n_head, cfg.n_query_groups, cfg.head_size
    qpkv, tot = nh // ng, nh // ng + 2
    scale, eps = 1.0 / math.sqrt(hs), cfg.norm_eps

    def rms(x, w):
        return x * jax.lax.rsqrt(jnp.mean(x * x, -1, keepdims=True) + eps) * w

    x = params["wte"][idx]
    pos = params["pos_cache"][jnp.arange(cfg.block_size)][None, :seq, :].astype(jnp.float32)
    x = x + pos
    tri = jnp.tril(jnp.ones((seq, seq), bool))
    bias = jnp.where(tri, 0.0, -1e30).astype(jnp.float32)
    for lp in params["layers"]:
        n1 = rms(x, lp["n1w"][0])
        qkv = (n1 @ lp["wqkv"]).reshape(batch, seq, ng, tot, hs)
        q = qkv[:, :, :, :qpkv, :].reshape(batch, seq, nh, hs).transpose(0, 2, 1, 3)
        k = qkv[:, :, :, qpkv:qpkv + 1, :].reshape(batch, seq, ng, hs).transpose(0, 2, 1, 3)
        v = qkv[:, :, :, qpkv + 1:, :].reshape(batch, seq, ng, hs).transpose(0, 2, 1, 3)
        k = jnp.repeat(k, qpkv, axis=1)
        v = jnp.repeat(v, qpkv, axis=1)
        s = jnp.einsum("bhld,bhsd->bhls", q, k) * scale + bias
        p = jax.nn.softmax(s, axis=-1)
        y = jnp.einsum("bhls,bhsd->bhld", p, v).transpose(0, 2, 1, 3).reshape(batch, seq, -1)
        x = x + y @ lp["wproj"]
        n2 = rms(x, lp["n2w"][0])
        x = x + (jax.nn.silu(n2 @ lp["w1"]) * (n2 @ lp["w2"])) @ lp["w3"]
    return rms(x, params["ln_f_w"][0]) @ params["lm_head_w"]


# ------------------------------- main -----------------------------------------
if __name__ == "__main__":
    key = jax.random.PRNGKey(0)
    pkey, ikey = jax.random.split(key)
    params = init_params(pkey, CFG)
    idx = jax.random.randint(ikey, (B, T), 0, CFG.padded_vocab_size, dtype=jnp.int32)

    state = prepare_state(params, CFG, B, T)   # hoisted out of the per-call path (run once)
    forward = make_forward(CFG, B, T)          # jitted forward (embedding + fused pallas_call)

    logits, all_attns, all_hiddens = gpt_forward(idx, state, forward, CFG)
    logits = jax.block_until_ready(logits)

    assert logits.shape == (B, T, CFG.padded_vocab_size)
    assert len(all_attns) == CFG.n_layer and all(a is None for a in all_attns)
    assert len(all_hiddens) == CFG.n_layer + 1
    assert all_hiddens[0].shape == (B, T, CFG.n_embd)

    ref = ref_forward(idx, params, CFG, B, T)
    diff = jnp.abs(logits - ref)
    max_err = float(jnp.max(diff))
    mean_err = float(jnp.mean(diff))
    # bf16 MXU operands + approx-reciprocal softmax => ~1% relative error on O(1) logits.
    assert max_err < 1e-1 and mean_err < 1e-2, f"max={max_err} mean={mean_err} vs reference"
    print("KERNEL_OK")
</pallas_src>

<mosaic_0001>
module attributes {stable_mosaic.version = 11 : i64} {
  func.func @fused_forward_kernel(%arg0: i32, %arg1: memref<16x32xf32, #tpu.memory_space<vmem>>, %arg2: memref<64x32xf32, #tpu.memory_space<vmem>>, %arg3: memref<2x32x64xbf16, #tpu.memory_space<vmem>>, %arg4: memref<2x32x32xbf16, #tpu.memory_space<vmem>>, %arg5: memref<2x1x32xf32, #tpu.memory_space<vmem>>, %arg6: memref<2x1x32xf32, #tpu.memory_space<vmem>>, %arg7: memref<2x32x128xbf16, #tpu.memory_space<vmem>>, %arg8: memref<2x64x32xbf16, #tpu.memory_space<vmem>>, %arg9: memref<1x32xf32, #tpu.memory_space<vmem>>, %arg10: memref<32x128xbf16, #tpu.memory_space<vmem>>, %arg11: memref<16x128xf32, #tpu.memory_space<vmem>>, %arg12: memref<2x16x32xf32, #tpu.memory_space<vmem>>) attributes {dimension_semantics = [#tpu.dimension_semantics<arbitrary>], iteration_bounds = array<i64: 1>, scalar_prefetch = 0 : i64, scratch_operands = 0 : i64, tpu.core_type = #tpu.core_type<tc>, window_params = [{pipeline_mode = #tpu.pipeline_mode<synchronous>, transform_indices = @transform_0, window_bounds = array<i64: 16, 32>}, {pipeline_mode = #tpu.pipeline_mode<synchronous>, transform_indices = @transform_1, window_bounds = array<i64: 64, 32>}, {pipeline_mode = #tpu.pipeline_mode<synchronous>, transform_indices = @transform_2, window_bounds = array<i64: 2, 32, 64>}, {pipeline_mode = #tpu.pipeline_mode<synchronous>, transform_indices = @transform_3, window_bounds = array<i64: 2, 32, 32>}, {pipeline_mode = #tpu.pipeline_mode<synchronous>, transform_indices = @transform_4, window_bounds = array<i64: 2, 1, 32>}, {pipeline_mode = #tpu.pipeline_mode<synchronous>, transform_indices = @transform_5, window_bounds = array<i64: 2, 1, 32>}, {pipeline_mode = #tpu.pipeline_mode<synchronous>, transform_indices = @transform_6, window_bounds = array<i64: 2, 32, 128>}, {pipeline_mode = #tpu.pipeline_mode<synchronous>, transform_indices = @transform_7, window_bounds = array<i64: 2, 64, 32>}, {pipeline_mode = #tpu.pipeline_mode<synchronous>, transform_indices = @transform_8, window_bounds = array<i64: 1, 32>}, {pipeline_mode = #tpu.pipeline_mode<synchronous>, transform_indices = @transform_9, window_bounds = array<i64: 32, 128>}, {pipeline_mode = #tpu.pipeline_mode<synchronous>, transform_indices = @transform_10, window_bounds = array<i64: 16, 128>}, {pipeline_mode = #tpu.pipeline_mode<synchronous>, transform_indices = @transform_11, window_bounds = array<i64: 2, 16, 32>}]} {
    %c0 = arith.constant 0 : index
    %c0_0 = arith.constant 0 : index
    %0 = vector.load %arg2[%c0, %c0_0] : memref<64x32xf32, #tpu.memory_space<vmem>>, vector<64x32xf32>
    %c0_1 = arith.constant 0 : index
    %c0_2 = arith.constant 0 : index
    %1 = vector.load %arg1[%c0_1, %c0_2] : memref<16x32xf32, #tpu.memory_space<vmem>>, vector<16x32xf32>
    %c0_3 = arith.constant 0 : index
    %c0_4 = arith.constant 0 : index
    %c0_5 = arith.constant 0 : index
    %2 = vector.load %arg5[%c0_3, %c0_4, %c0_5] : memref<2x1x32xf32, #tpu.memory_space<vmem>>, vector<1x1x32xf32>
    %3 = vector.shape_cast %2 : vector<1x1x32xf32> to vector<1x32xf32>
    %4 = arith.mulf %1, %1 : vector<16x32xf32>
    %cst = arith.constant dense<0.000000e+00> : vector<16xf32>
    %5 = vector.multi_reduction <add>, %4, %cst [1] : vector<16x32xf32> to vector<16xf32>
    %6 = vector.shape_cast %5 : vector<16xf32> to vector<16x1xf32>
    %cst_6 = arith.constant 3.200000e+01 : f32
    %7 = vector.broadcast %cst_6 : f32 to vector<16x1xf32>
    %8 = arith.divf %6, %7 : vector<16x1xf32>
    %cst_7 = arith.constant 9.99999974E-6 : f32
    %9 = vector.broadcast %cst_7 : f32 to vector<16x1xf32>
    %10 = arith.addf %8, %9 : vector<16x1xf32>
    %11 = math.rsqrt %10 : vector<16x1xf32>
    %12 = vector.broadcast %11 : vector<16x1xf32> to vector<16x32xf32>
    %13 = arith.mulf %1, %12 : vector<16x32xf32>
    %14 = vector.broadcast %3 : vector<1x32xf32> to vector<16x32xf32>
    %15 = arith.mulf %13, %14 : vector<16x32xf32>
    %16 = arith.truncf %15 : vector<16x32xf32> to vector<16x32xbf16>
    %c0_8 = arith.constant 0 : index
    %c0_9 = arith.constant 0 : index
    %c0_10 = arith.constant 0 : index
    %17 = vector.load %arg3[%c0_8, %c0_9, %c0_10] : memref<2x32x64xbf16, #tpu.memory_space<vmem>>, vector<1x32x64xbf16>
    %18 = vector.shape_cast %17 : vector<1x32x64xbf16> to vector<32x64xbf16>
    %cst_11 = arith.constant dense<0.000000e+00> : vector<16x64xf32>
    %19 = tpu.matmul %16, %18, %cst_11 {dimension_numbers = #tpu.dot_dimension_numbers<[1], [0], [0], [1], [0, 0, 1, 1], [], []>} : vector<16x32xbf16>, vector<32x64xbf16>, vector<16x64xf32> -> vector<16x64xf32>
    %20 = vector.extract_strided_slice %19 {offsets = [0, 0], sizes = [16, 8], strides = [1, 1]} : vector<16x64xf32> to vector<16x8xf32>
    %21 = vector.extract_strided_slice %19 {offsets = [0, 8], sizes = [16, 8], strides = [1, 1]} : vector<16x64xf32> to vector<16x8xf32>
    %22 = vector.extract_strided_slice %19 {offsets = [0, 16], sizes = [16, 8], strides = [1, 1]} : vector<16x64xf32> to vector<16x8xf32>
    %23 = vector.extract_strided_slice %19 {offsets = [0, 24], sizes = [16, 8], strides = [1, 1]} : vector<16x64xf32> to vector<16x8xf32>
    %24 = tpu.concatenate %20, %21, %22, %23 in 0 : vector<16x8xf32>, vector<16x8xf32>, vector<16x8xf32>, vector<16x8xf32> -> vector<64x8xf32>
    %25 = vector.extract_strided_slice %19 {offsets = [0, 32], sizes = [16, 8], strides = [1, 1]} : vector<16x64xf32> to vector<16x8xf32>
    %26 = vector.extract_strided_slice %19 {offsets = [0, 40], sizes = [16, 8], strides = [1, 1]} : vector<16x64xf32> to vector<16x8xf32>
    %27 = tpu.concatenate %25, %26 in 0 : vector<16x8xf32>, vector<16x8xf32> -> vector<32x8xf32>
    %28 = vector.extract_strided_slice %19 {offsets = [0, 48], sizes = [16, 8], strides = [1, 1]} : vector<16x64xf32> to vector<16x8xf32>
    %29 = vector.extract_strided_slice %19 {offsets = [0, 56], sizes = [16, 8], strides = [1, 1]} : vector<16x64xf32> to vector<16x8xf32>
    %30 = tpu.concatenate %28, %29 in 0 : vector<16x8xf32>, vector<16x8xf32> -> vector<32x8xf32>
    %31 = arith.truncf %24 : vector<64x8xf32> to vector<64x8xbf16>
    %32 = arith.truncf %27 : vector<32x8xf32> to vector<32x8xbf16>
    %cst_12 = arith.constant dense<0.000000e+00> : vector<64x32xf32>
    %33 = tpu.matmul %31, %32, %cst_12 {dimension_numbers = #tpu.dot_dimension_numbers<[1], [1], [0], [0], [0, 0, 1, 0], [], []>} : vector<64x8xbf16>, vector<32x8xbf16>, vector<64x32xf32> -> vector<64x32xf32>
    %34 = arith.addf %33, %0 : vector<64x32xf32>
    %cst_13 = arith.constant dense<0xFF800000> : vector<64xf32>
    %35 = vector.multi_reduction <maximumf>, %34, %cst_13 [1] : vector<64x32xf32> to vector<64xf32>
    %36 = vector.shape_cast %35 : vector<64xf32> to vector<64x1xf32>
    %37 = vector.broadcast %36 : vector<64x1xf32> to vector<64x32xf32>
    %38 = arith.subf %34, %37 : vector<64x32xf32>
    %39 = math.exp %38 : vector<64x32xf32>
    %cst_14 = arith.constant dense<0.000000e+00> : vector<64xf32>
    %40 = vector.multi_reduction <add>, %39, %cst_14 [1] : vector<64x32xf32> to vector<64xf32>
    %41 = vector.shape_cast %40 : vector<64xf32> to vector<64x1xf32>
    %42 = tpu.reciprocal %41 {approx = true} : vector<64x1xf32> -> vector<64x1xf32>
    %43 = vector.broadcast %42 : vector<64x1xf32> to vector<64x32xf32>
    %44 = arith.mulf %39, %43 : vector<64x32xf32>
    %45 = arith.truncf %44 : vector<64x32xf32> to vector<64x32xbf16>
    %46 = arith.truncf %30 : vector<32x8xf32> to vector<32x8xbf16>
    %cst_15 = arith.constant dense<0.000000e+00> : vector<64x8xf32>
    %47 = tpu.matmul %45, %46, %cst_15 {dimension_numbers = #tpu.dot_dimension_numbers<[1], [0], [0], [1], [0, 0, 1, 1], [], []>} : vector<64x32xbf16>, vector<32x8xbf16>, vector<64x8xf32> -> vector<64x8xf32>
    %48 = vector.extract_strided_slice %47 {offsets = [0, 0], sizes = [16, 8], strides = [1, 1]} : vector<64x8xf32> to vector<16x8xf32>
    %49 = vector.extract_strided_slice %47 {offsets = [16, 0], sizes = [16, 8], strides = [1, 1]} : vector<64x8xf32> to vector<16x8xf32>
    %50 = vector.extract_strided_slice %47 {offsets = [32, 0], sizes = [16, 8], strides = [1, 1]} : vector<64x8xf32> to vector<16x8xf32>
    %51 = vector.extract_strided_slice %47 {offsets = [48, 0], sizes = [16, 8], strides = [1, 1]} : vector<64x8xf32> to vector<16x8xf32>
    %52 = tpu.concatenate %48, %49, %50, %51 in 1 : vector<16x8xf32>, vector<16x8xf32>, vector<16x8xf32>, vector<16x8xf32> -> vector<16x32xf32>
    %53 = arith.truncf %52 : vector<16x32xf32> to vector<16x32xbf16>
    %c0_16 = arith.constant 0 : index
    %c0_17 = arith.constant 0 : index
    %c0_18 = arith.constant 0 : index
    %54 = vector.load %arg4[%c0_16, %c0_17, %c0_18] : memref<2x32x32xbf16, #tpu.memory_space<vmem>>, vector<1x32x32xbf16>
    %55 = vector.shape_cast %54 : vector<1x32x32xbf16> to vector<32x32xbf16>
    %cst_19 = arith.constant dense<0.000000e+00> : vector<16x32xf32>
    %56 = tpu.matmul %53, %55, %cst_19 {dimension_numbers = #tpu.dot_dimension_numbers<[1], [0], [0], [1], [0, 0, 1, 1], [], []>} : vector<16x32xbf16>, vector<32x32xbf16>, vector<16x32xf32> -> vector<16x32xf32>
    %57 = arith.addf %1, %56 : vector<16x32xf32>
    %c0_20 = arith.constant 0 : index
    %c0_21 = arith.constant 0 : index
    %c0_22 = arith.constant 0 : index
    %58 = vector.load %arg6[%c0_20, %c0_21, %c0_22] : memref<2x1x32xf32, #tpu.memory_space<vmem>>, vector<1x1x32xf32>
    %59 = vector.shape_cast %58 : vector<1x1x32xf32> to vector<1x32xf32>
    %60 = arith.mulf %57, %57 : vector<16x32xf32>
    %cst_23 = arith.constant dense<0.000000e+00> : vector<16xf32>
    %61 = vector.multi_reduction <add>, %60, %cst_23 [1] : vector<16x32xf32> to vector<16xf32>
    %62 = vector.shape_cast %61 : vector<16xf32> to vector<16x1xf32>
    %cst_24 = arith.constant 3.200000e+01 : f32
    %63 = vector.broadcast %cst_24 : f32 to vector<16x1xf32>
    %64 = arith.divf %62, %63 : vector<16x1xf32>
    %cst_25 = arith.constant 9.99999974E-6 : f32
    %65 = vector.broadcast %cst_25 : f32 to vector<16x1xf32>
    %66 = arith.addf %64, %65 : vector<16x1xf32>
    %67 = math.rsqrt %66 : vector<16x1xf32>
    %68 = vector.broadcast %67 : vector<16x1xf32> to vector<16x32xf32>
    %69 = arith.mulf %57, %68 : vector<16x32xf32>
    %70 = vector.broadcast %59 : vector<1x32xf32> to vector<16x32xf32>
    %71 = arith.mulf %69, %70 : vector<16x32xf32>
    %72 = arith.truncf %71 : vector<16x32xf32> to vector<16x32xbf16>
    %c0_26 = arith.constant 0 : index
    %c0_27 = arith.constant 0 : index
    %c0_28 = arith.constant 0 : index
    %73 = vector.load %arg7[%c0_26, %c0_27, %c0_28] : memref<2x32x128xbf16, #tpu.memory_space<vmem>>, vector<1x32x128xbf16>
    %74 = vector.shape_cast %73 : vector<1x32x128xbf16> to vector<32x128xbf16>
    %cst_29 = arith.constant dense<0.000000e+00> : vector<16x128xf32>
    %75 = tpu.matmul %72, %74, %cst_29 {dimension_numbers = #tpu.dot_dimension_numbers<[1], [0], [0], [1], [0, 0, 1, 1], [], []>} : vector<16x32xbf16>, vector<32x128xbf16>, vector<16x128xf32> -> vector<16x128xf32>
    %76 = vector.extract_strided_slice %75 {offsets = [0, 0], sizes = [16, 64], strides = [1, 1]} : vector<16x128xf32> to vector<16x64xf32>
    %77 = arith.negf %76 : vector<16x64xf32>
    %78 = math.exp %77 : vector<16x64xf32>
    %cst_30 = arith.constant 1.000000e+00 : f32
    %79 = vector.broadcast %cst_30 : f32 to vector<16x64xf32>
    %80 = arith.addf %79, %78 : vector<16x64xf32>
    %81 = arith.divf %79, %80 : vector<16x64xf32>
    %82 = arith.mulf %76, %81 : vector<16x64xf32>
    %83 = vector.extract_strided_slice %75 {offsets = [0, 64], sizes = [16, 64], strides = [1, 1]} : vector<16x128xf32> to vector<16x64xf32>
    %84 = arith.mulf %82, %83 : vector<16x64xf32>
    %85 = arith.truncf %84 : vector<16x64xf32> to vector<16x64xbf16>
    %c0_31 = arith.constant 0 : index
    %c0_32 = arith.constant 0 : index
    %c0_33 = arith.constant 0 : index
    %86 = vector.load %arg8[%c0_31, %c0_32, %c0_33] : memref<2x64x32xbf16, #tpu.memory_space<vmem>>, vector<1x64x32xbf16>
    %87 = vector.shape_cast %86 : vector<1x64x32xbf16> to vector<64x32xbf16>
    %cst_34 = arith.constant dense<0.000000e+00> : vector<16x32xf32>
    %88 = tpu.matmul %85, %87, %cst_34 {dimension_numbers = #tpu.dot_dimension_numbers<[1], [0], [0], [1], [0, 0, 1, 1], [], []>} : vector<16x64xbf16>, vector<64x32xbf16>, vector<16x32xf32> -> vector<16x32xf32>
    %89 = arith.addf %57, %88 : vector<16x32xf32>
    %c0_35 = arith.constant 0 : index
    %c0_36 = arith.constant 0 : index
    %c0_37 = arith.constant 0 : index
    %90 = vector.load %arg12[%c0_35, %c0_36, %c0_37] : memref<2x16x32xf32, #tpu.memory_space<vmem>>, vector<1x16x32xf32>
    %91 = vector.shape_cast %90 : vector<1x16x32xf32> to vector<16x32xf32>
    %92 = vector.shape_cast %89 : vector<16x32xf32> to vector<1x16x32xf32>
    tpu.vector_store %arg12[%c0_35, %c0_36, %c0_37], %92 {strides = array<i32>} : memref<2x16x32xf32, #tpu.memory_space<vmem>>, vector<1x16x32xf32>,
    %c1 = arith.constant 1 : index
    %c0_38 = arith.constant 0 : index
    %c0_39 = arith.constant 0 : index
    %93 = vector.load %arg5[%c1, %c0_38, %c0_39] : memref<2x1x32xf32, #tpu.memory_space<vmem>>, vector<1x1x32xf32>
    %94 = vector.shape_cast %93 : vector<1x1x32xf32> to vector<1x32xf32>
    %95 = arith.mulf %89, %89 : vector<16x32xf32>
    %cst_40 = arith.constant dense<0.000000e+00> : vector<16xf32>
    %96 = vector.multi_reduction <add>, %95, %cst_40 [1] : vector<16x32xf32> to vector<16xf32>
    %97 = vector.shape_cast %96 : vector<16xf32> to vector<16x1xf32>
    %cst_41 = arith.constant 3.200000e+01 : f32
    %98 = vector.broadcast %cst_41 : f32 to vector<16x1xf32>
    %99 = arith.divf %97, %98 : vector<16x1xf32>
    %cst_42 = arith.constant 9.99999974E-6 : f32
    %100 = vector.broadcast %cst_42 : f32 to vector<16x1xf32>
    %101 = arith.addf %99, %100 : vector<16x1xf32>
    %102 = math.rsqrt %101 : vector<16x1xf32>
    %103 = vector.broadcast %102 : vector<16x1xf32> to vector<16x32xf32>
    %104 = arith.mulf %89, %103 : vector<16x32xf32>
    %105 = vector.broadcast %94 : vector<1x32xf32> to vector<16x32xf32>
    %106 = arith.mulf %104, %105 : vector<16x32xf32>
    %107 = arith.truncf %106 : vector<16x32xf32> to vector<16x32xbf16>
    %c1_43 = arith.constant 1 : index
    %c0_44 = arith.constant 0 : index
    %c0_45 = arith.constant 0 : index
    %108 = vector.load %arg3[%c1_43, %c0_44, %c0_45] : memref<2x32x64xbf16, #tpu.memory_space<vmem>>, vector<1x32x64xbf16>
    %109 = vector.shape_cast %108 : vector<1x32x64xbf16> to vector<32x64xbf16>
    %cst_46 = arith.constant dense<0.000000e+00> : vector<16x64xf32>
    %110 = tpu.matmul %107, %109, %cst_46 {dimension_numbers = #tpu.dot_dimension_numbers<[1], [0], [0], [1], [0, 0, 1, 1], [], []>} : vector<16x32xbf16>, vector<32x64xbf16>, vector<16x64xf32> -> vector<16x64xf32>
    %111 = vector.extract_strided_slice %110 {offsets = [0, 0], sizes = [16, 8], strides = [1, 1]} : vector<16x64xf32> to vector<16x8xf32>
    %112 = vector.extract_strided_slice %110 {offsets = [0, 8], sizes = [16, 8], strides = [1, 1]} : vector<16x64xf32> to vector<16x8xf32>
    %113 = vector.extract_strided_slice %110 {offsets = [0, 16], sizes = [16, 8], strides = [1, 1]} : vector<16x64xf32> to vector<16x8xf32>
    %114 = vector.extract_strided_slice %110 {offsets = [0, 24], sizes = [16, 8], strides = [1, 1]} : vector<16x64xf32> to vector<16x8xf32>
    %115 = tpu.concatenate %111, %112, %113, %114 in 0 : vector<16x8xf32>, vector<16x8xf32>, vector<16x8xf32>, vector<16x8xf32> -> vector<64x8xf32>
    %116 = vector.extract_strided_slice %110 {offsets = [0, 32], sizes = [16, 8], strides = [1, 1]} : vector<16x64xf32> to vector<16x8xf32>
    %117 = vector.extract_strided_slice %110 {offsets = [0, 40], sizes = [16, 8], strides = [1, 1]} : vector<16x64xf32> to vector<16x8xf32>
    %118 = tpu.concatenate %116, %117 in 0 : vector<16x8xf32>, vector<16x8xf32> -> vector<32x8xf32>
    %119 = vector.extract_strided_slice %110 {offsets = [0, 48], sizes = [16, 8], strides = [1, 1]} : vector<16x64xf32> to vector<16x8xf32>
    %120 = vector.extract_strided_slice %110 {offsets = [0, 56], sizes = [16, 8], strides = [1, 1]} : vector<16x64xf32> to vector<16x8xf32>
    %121 = tpu.concatenate %119, %120 in 0 : vector<16x8xf32>, vector<16x8xf32> -> vector<32x8xf32>
    %122 = arith.truncf %115 : vector<64x8xf32> to vector<64x8xbf16>
    %123 = arith.truncf %118 : vector<32x8xf32> to vector<32x8xbf16>
    %cst_47 = arith.constant dense<0.000000e+00> : vector<64x32xf32>
    %124 = tpu.matmul %122, %123, %cst_47 {dimension_numbers = #tpu.dot_dimension_numbers<[1], [1], [0], [0], [0, 0, 1, 0], [], []>} : vector<64x8xbf16>, vector<32x8xbf16>, vector<64x32xf32> -> vector<64x32xf32>
    %125 = arith.addf %124, %0 : vector<64x32xf32>
    %cst_48 = arith.constant dense<0xFF800000> : vector<64xf32>
    %126 = vector.multi_reduction <maximumf>, %125, %cst_48 [1] : vector<64x32xf32> to vector<64xf32>
    %127 = vector.shape_cast %126 : vector<64xf32> to vector<64x1xf32>
    %128 = vector.broadcast %127 : vector<64x1xf32> to vector<64x32xf32>
    %129 = arith.subf %125, %128 : vector<64x32xf32>
    %130 = math.exp %129 : vector<64x32xf32>
    %cst_49 = arith.constant dense<0.000000e+00> : vector<64xf32>
    %131 = vector.multi_reduction <add>, %130, %cst_49 [1] : vector<64x32xf32> to vector<64xf32>
    %132 = vector.shape_cast %131 : vector<64xf32> to vector<64x1xf32>
    %133 = tpu.reciprocal %132 {approx = true} : vector<64x1xf32> -> vector<64x1xf32>
    %134 = vector.broadcast %133 : vector<64x1xf32> to vector<64x32xf32>
    %135 = arith.mulf %130, %134 : vector<64x32xf32>
    %136 = arith.truncf %135 : vector<64x32xf32> to vector<64x32xbf16>
    %137 = arith.truncf %121 : vector<32x8xf32> to vector<32x8xbf16>
    %cst_50 = arith.constant dense<0.000000e+00> : vector<64x8xf32>
    %138 = tpu.matmul %136, %137, %cst_50 {dimension_numbers = #tpu.dot_dimension_numbers<[1], [0], [0], [1], [0, 0, 1, 1], [], []>} : vector<64x32xbf16>, vector<32x8xbf16>, vector<64x8xf32> -> vector<64x8xf32>
    %139 = vector.extract_strided_slice %138 {offsets = [0, 0], sizes = [16, 8], strides = [1, 1]} : vector<64x8xf32> to vector<16x8xf32>
    %140 = vector.extract_strided_slice %138 {offsets = [16, 0], sizes = [16, 8], strides = [1, 1]} : vector<64x8xf32> to vector<16x8xf32>
    %141 = vector.extract_strided_slice %138 {offsets = [32, 0], sizes = [16, 8], strides = [1, 1]} : vector<64x8xf32> to vector<16x8xf32>
    %142 = vector.extract_strided_slice %138 {offsets = [48, 0], sizes = [16, 8], strides = [1, 1]} : vector<64x8xf32> to vector<16x8xf32>
    %143 = tpu.concatenate %139, %140, %141, %142 in 1 : vector<16x8xf32>, vector<16x8xf32>, vector<16x8xf32>, vector<16x8xf32> -> vector<16x32xf32>
    %144 = arith.truncf %143 : vector<16x32xf32> to vector<16x32xbf16>
    %c1_51 = arith.constant 1 : index
    %c0_52 = arith.constant 0 : index
    %c0_53 = arith.constant 0 : index
    %145 = vector.load %arg4[%c1_51, %c0_52, %c0_53] : memref<2x32x32xbf16, #tpu.memory_space<vmem>>, vector<1x32x32xbf16>
    %146 = vector.shape_cast %145 : vector<1x32x32xbf16> to vector<32x32xbf16>
    %cst_54 = arith.constant dense<0.000000e+00> : vector<16x32xf32>
    %147 = tpu.matmul %144, %146, %cst_54 {dimension_numbers = #tpu.dot_dimension_numbers<[1], [0], [0], [1], [0, 0, 1, 1], [], []>} : vector<16x32xbf16>, vector<32x32xbf16>, vector<16x32xf32> -> vector<16x32xf32>
    %148 = arith.addf %89, %147 : vector<16x32xf32>
    %c1_55 = arith.constant 1 : index
    %c0_56 = arith.constant 0 : index
    %c0_57 = arith.constant 0 : index
    %149 = vector.load %arg6[%c1_55, %c0_56, %c0_57] : memref<2x1x32xf32, #tpu.memory_space<vmem>>, vector<1x1x32xf32>
    %150 = vector.shape_cast %149 : vector<1x1x32xf32> to vector<1x32xf32>
    %151 = arith.mulf %148, %148 : vector<16x32xf32>
    %cst_58 = arith.constant dense<0.000000e+00> : vector<16xf32>
    %152 = vector.multi_reduction <add>, %151, %cst_58 [1] : vector<16x32xf32> to vector<16xf32>
    %153 = vector.shape_cast %152 : vector<16xf32> to vector<16x1xf32>
    %cst_59 = arith.constant 3.200000e+01 : f32
    %154 = vector.broadcast %cst_59 : f32 to vector<16x1xf32>
    %155 = arith.divf %153, %154 : vector<16x1xf32>
    %cst_60 = arith.constant 9.99999974E-6 : f32
    %156 = vector.broadcast %cst_60 : f32 to vector<16x1xf32>
    %157 = arith.addf %155, %156 : vector<16x1xf32>
    %158 = math.rsqrt %157 : vector<16x1xf32>
    %159 = vector.broadcast %158 : vector<16x1xf32> to vector<16x32xf32>
    %160 = arith.mulf %148, %159 : vector<16x32xf32>
    %161 = vector.broadcast %150 : vector<1x32xf32> to vector<16x32xf32>
    %162 = arith.mulf %160, %161 : vector<16x32xf32>
    %163 = arith.truncf %162 : vector<16x32xf32> to vector<16x32xbf16>
    %c1_61 = arith.constant 1 : index
    %c0_62 = arith.constant 0 : index
    %c0_63 = arith.constant 0 : index
    %164 = vector.load %arg7[%c1_61, %c0_62, %c0_63] : memref<2x32x128xbf16, #tpu.memory_space<vmem>>, vector<1x32x128xbf16>
    %165 = vector.shape_cast %164 : vector<1x32x128xbf16> to vector<32x128xbf16>
    %cst_64 = arith.constant dense<0.000000e+00> : vector<16x128xf32>
    %166 = tpu.matmul %163, %165, %cst_64 {dimension_numbers = #tpu.dot_dimension_numbers<[1], [0], [0], [1], [0, 0, 1, 1], [], []>} : vector<16x32xbf16>, vector<32x128xbf16>, vector<16x128xf32> -> vector<16x128xf32>
    %167 = vector.extract_strided_slice %166 {offsets = [0, 0], sizes = [16, 64], strides = [1, 1]} : vector<16x128xf32> to vector<16x64xf32>
    %168 = arith.negf %167 : vector<16x64xf32>
    %169 = math.exp %168 : vector<16x64xf32>
    %cst_65 = arith.constant 1.000000e+00 : f32
    %170 = vector.broadcast %cst_65 : f32 to vector<16x64xf32>
    %171 = arith.addf %170, %169 : vector<16x64xf32>
    %172 = arith.divf %170, %171 : vector<16x64xf32>
    %173 = arith.mulf %167, %172 : vector<16x64xf32>
    %174 = vector.extract_strided_slice %166 {offsets = [0, 64], sizes = [16, 64], strides = [1, 1]} : vector<16x128xf32> to vector<16x64xf32>
    %175 = arith.mulf %173, %174 : vector<16x64xf32>
    %176 = arith.truncf %175 : vector<16x64xf32> to vector<16x64xbf16>
    %c1_66 = arith.constant 1 : index
    %c0_67 = arith.constant 0 : index
    %c0_68 = arith.constant 0 : index
    %177 = vector.load %arg8[%c1_66, %c0_67, %c0_68] : memref<2x64x32xbf16, #tpu.memory_space<vmem>>, vector<1x64x32xbf16>
    %178 = vector.shape_cast %177 : vector<1x64x32xbf16> to vector<64x32xbf16>
    %cst_69 = arith.constant dense<0.000000e+00> : vector<16x32xf32>
    %179 = tpu.matmul %176, %178, %cst_69 {dimension_numbers = #tpu.dot_dimension_numbers<[1], [0], [0], [1], [0, 0, 1, 1], [], []>} : vector<16x64xbf16>, vector<64x32xbf16>, vector<16x32xf32> -> vector<16x32xf32>
    %180 = arith.addf %148, %179 : vector<16x32xf32>
    %c1_70 = arith.constant 1 : index
    %c0_71 = arith.constant 0 : index
    %c0_72 = arith.constant 0 : index
    %181 = vector.load %arg12[%c1_70, %c0_71, %c0_72] : memref<2x16x32xf32, #tpu.memory_space<vmem>>, vector<1x16x32xf32>
    %182 = vector.shape_cast %181 : vector<1x16x32xf32> to vector<16x32xf32>
    %183 = vector.shape_cast %180 : vector<16x32xf32> to vector<1x16x32xf32>
    tpu.vector_store %arg12[%c1_70, %c0_71, %c0_72], %183 {strides = array<i32>} : memref<2x16x32xf32, #tpu.memory_space<vmem>>, vector<1x16x32xf32>,
    %c0_73 = arith.constant 0 : index
    %c0_74 = arith.constant 0 : index
    %184 = vector.load %arg9[%c0_73, %c0_74] : memref<1x32xf32, #tpu.memory_space<vmem>>, vector<1x32xf32>
    %185 = arith.mulf %180, %180 : vector<16x32xf32>
    %cst_75 = arith.constant dense<0.000000e+00> : vector<16xf32>
    %186 = vector.multi_reduction <add>, %185, %cst_75 [1] : vector<16x32xf32> to vector<16xf32>
    %187 = vector.shape_cast %186 : vector<16xf32> to vector<16x1xf32>
    %cst_76 = arith.constant 3.200000e+01 : f32
    %188 = vector.broadcast %cst_76 : f32 to vector<16x1xf32>
    %189 = arith.divf %187, %188 : vector<16x1xf32>
    %cst_77 = arith.constant 9.99999974E-6 : f32
    %190 = vector.broadcast %cst_77 : f32 to vector<16x1xf32>
    %191 = arith.addf %189, %190 : vector<16x1xf32>
    %192 = math.rsqrt %191 : vector<16x1xf32>
    %193 = vector.broadcast %192 : vector<16x1xf32> to vector<16x32xf32>
    %194 = arith.mulf %180, %193 : vector<16x32xf32>
    %195 = vector.broadcast %184 : vector<1x32xf32> to vector<16x32xf32>
    %196 = arith.mulf %194, %195 : vector<16x32xf32>
    %197 = arith.truncf %196 : vector<16x32xf32> to vector<16x32xbf16>
    %c0_78 = arith.constant 0 : index
    %c0_79 = arith.constant 0 : index
    %198 = vector.load %arg10[%c0_78, %c0_79] : memref<32x128xbf16, #tpu.memory_space<vmem>>, vector<32x128xbf16>
    %cst_80 = arith.constant dense<0.000000e+00> : vector<16x128xf32>
    %199 = tpu.matmul %197, %198, %cst_80 {dimension_numbers = #tpu.dot_dimension_numbers<[1], [0], [0], [1], [0, 0, 1, 1], [], []>} : vector<16x32xbf16>, vector<32x128xbf16>, vector<16x128xf32> -> vector<16x128xf32>
    %c0_81 = arith.constant 0 : index
    %c0_82 = arith.constant 0 : index
    %200 = vector.load %arg11[%c0_81, %c0_82] : memref<16x128xf32, #tpu.memory_space<vmem>>, vector<16x128xf32>
    tpu.vector_store %arg11[%c0_81, %c0_82], %199 {strides = array<i32>} : memref<16x128xf32, #tpu.memory_space<vmem>>, vector<16x128xf32>,
    return
  }
  func.func @transform_0(%arg0: i32) -> (i32, i32) {
    %c0_i32 = arith.constant 0 : i32
    %c0_i32_0 = arith.constant 0 : i32
    %c0_i32_1 = arith.constant 0 : i32
    return %c0_i32, %c0_i32_0 : i32, i32
  }
  func.func @transform_1(%arg0: i32) -> (i32, i32) {
    %c0_i32 = arith.constant 0 : i32
    %c0_i32_0 = arith.constant 0 : i32
    %c0_i32_1 = arith.constant 0 : i32
    return %c0_i32, %c0_i32_0 : i32, i32
  }
  func.func @transform_2(%arg0: i32) -> (i32, i32, i32) {
    %c0_i32 = arith.constant 0 : i32
    %c0_i32_0 = arith.constant 0 : i32
    %c0_i32_1 = arith.constant 0 : i32
    %c0_i32_2 = arith.constant 0 : i32
    return %c0_i32, %c0_i32_0, %c0_i32_1 : i32, i32, i32
  }
  func.func @transform_3(%arg0: i32) -> (i32, i32, i32) {
    %c0_i32 = arith.constant 0 : i32
    %c0_i32_0 = arith.constant 0 : i32
    %c0_i32_1 = arith.constant 0 : i32
    %c0_i32_2 = arith.constant 0 : i32
    return %c0_i32, %c0_i32_0, %c0_i32_1 : i32, i32, i32
  }
  func.func @transform_4(%arg0: i32) -> (i32, i32, i32) {
    %c0_i32 = arith.constant 0 : i32
    %c0_i32_0 = arith.constant 0 : i32
    %c0_i32_1 = arith.constant 0 : i32
    %c0_i32_2 = arith.constant 0 : i32
    return %c0_i32, %c0_i32_0, %c0_i32_1 : i32, i32, i32
  }
  func.func @transform_5(%arg0: i32) -> (i32, i32, i32) {
    %c0_i32 = arith.constant 0 : i32
    %c0_i32_0 = arith.constant 0 : i32
    %c0_i32_1 = arith.constant 0 : i32
    %c0_i32_2 = arith.constant 0 : i32
    return %c0_i32, %c0_i32_0, %c0_i32_1 : i32, i32, i32
  }
  func.func @transform_6(%arg0: i32) -> (i32, i32, i32) {
    %c0_i32 = arith.constant 0 : i32
    %c0_i32_0 = arith.constant 0 : i32
    %c0_i32_1 = arith.constant 0 : i32
    %c0_i32_2 = arith.constant 0 : i32
    return %c0_i32, %c0_i32_0, %c0_i32_1 : i32, i32, i32
  }
  func.func @transform_7(%arg0: i32) -> (i32, i32, i32) {
    %c0_i32 = arith.constant 0 : i32
    %c0_i32_0 = arith.constant 0 : i32
    %c0_i32_1 = arith.constant 0 : i32
    %c0_i32_2 = arith.constant 0 : i32
    return %c0_i32, %c0_i32_0, %c0_i32_1 : i32, i32, i32
  }
  func.func @transform_8(%arg0: i32) -> (i32, i32) {
    %c0_i32 = arith.constant 0 : i32
    %c0_i32_0 = arith.constant 0 : i32
    %c0_i32_1 = arith.constant 0 : i32
    return %c0_i32, %c0_i32_0 : i32, i32
  }
  func.func @transform_9(%arg0: i32) -> (i32, i32) {
    %c0_i32 = arith.constant 0 : i32
    %c0_i32_0 = arith.constant 0 : i32
    %c0_i32_1 = arith.constant 0 : i32
    return %c0_i32, %c0_i32_0 : i32, i32
  }
  func.func @transform_10(%arg0: i32) -> (i32, i32) {
    %c0_i32 = arith.constant 0 : i32
    %c0_i32_0 = arith.constant 0 : i32
    %c0_i32_1 = arith.constant 0 : i32
    return %c0_i32, %c0_i32_0 : i32, i32
  }
  func.func @transform_11(%arg0: i32) -> (i32, i32, i32) {
    %c0_i32 = arith.constant 0 : i32
    %c0_i32_0 = arith.constant 0 : i32
    %c0_i32_1 = arith.constant 0 : i32
    %c0_i32_2 = arith.constant 0 : i32
    return %c0_i32, %c0_i32_0, %c0_i32_1 : i32, i32, i32
  }
}

</mosaic_0001>

<bundles_post_ra>
// kernel: fwd.1
= control target key start
LH: loop header
LB: loop body
LE: loop exit
PB: predicated region body
PF: predicated region fallthrough
CT: control target
= control target key end

     0   :  { %17 = vsyncpa [#allocation3], 0  ;;  %vm53_vm0 = vcmask 261120   ;;  %s2480_s0 = inlined_call_operand.vmem [shape: f32[16,32], index: 0, kind: input, shape index: {}]   ;;  %s2481_s1 = inlined_call_operand.vmem [shape: f32[64,32], index: 1, kind: input, shape index: {}]   ;;  %s2482_s2 = inlined_call_operand.vmem [shape: bf16[2,32,64], index: 2, kind: input, shape index: {}]   ;;  %s2483_s3 = inlined_call_operand.vmem [shape: bf16[2,32,32], index: 3, kind: input, shape index: {}]   ;;  %s2484_s4 = inlined_call_operand.vmem [shape: f32[2,1,32], index: 4, kind: input, shape index: {}]   ;;  %s2485_s5 = inlined_call_operand.vmem [shape: f32[2,1,32], index: 5, kind: input, shape index: {}]   ;;  %s2486_s6 = inlined_call_operand.vmem [shape: bf16[2,32,128], index: 6, kind: input, shape index: {}]   ;;  %s2487_s7 = inlined_call_operand.vmem [shape: bf16[2,64,32], index: 7, kind: input, shape index: {}]   ;;  %s2488_s8 = inlined_call_operand.vmem [shape: f32[1,32], index: 8, kind: input, shape index: {}]   ;;  %s2489_s9 = inlined_call_operand.vmem [shape: bf16[32,128], index: 9, kind: input, shape index: {}]   ;;  %s2490_s10 = inlined_call_operand.hbm [shape: f32[16,128], index: 10, kind: output, shape index: {0}]   ;;  %s2491_s11 = inlined_call_operand.hbm [shape: f32[2,16,32], index: 11, kind: output, shape index: {1}]  }
   0x1   :  { %v2085_v0 = vld [vmem:[%s2480_s0] sm:$0xff]  ;;  %v2090_v1 = vld [vmem:[%s2480_s0 + $0x8] sm:$0xff] }
   0x2   :  { %v51_v2 = vmul.f32 %v2085_v0, %v2085_v0  ;;  %v52_v3 = vmul.f32 %v2090_v1, %v2090_v1 }
   0x4   :  { %v54_v4 = vsel %vm53_vm0, %v51_v2, 0.0  ;;  %v57_v5 = vsel %vm53_vm0, %v52_v3, 0.0 }
   0x5   :  { %55 = vadd.xlane.f32.xlu0 %v54_v4 }
   0x9   :  { %58 = vadd.xlane.f32.xlu0 %v57_v5 }
   0xa   :  { %18 = vsyncpa [#allocation5], 0  ;;  %v1838_v6 = vld [vmem:[%s2482_s2] sm:$0xff]   ;;  %v2008_v7 = vmov 0.0   ;;  %vm2009_vm1 = vmmov 0   ;;  %v1839_v8 = vld [vmem:[%s2482_s2 + $0x8] sm:$0xff]  }
   0xb   :  { %1632 = vmatprep.subr.bf16.mxu0 %v2008_v7  ;;  %1636 = vmatprep.mubr.msk.bf16.mxu0 %vm2009_vm1, %v2008_v7  ;;  %v1499_v18 = vld [vmem:[%s2484_s4] ss:$0 sm:$0xff]  ;;  %vm168_vm2 = vcmask 64512   ;;  %s2010_s26 = smov 120   ;;  %s2011_s27 = smov 96   ;;  %v2146_v47 = vld [vmem:[%s2481_s1 + $0x10] sm:$0xff] }
   0xc   :  { %1633 = vmatpush3.bf16.msra.mxu0 %v1838_v6  ;;  %s2012_s28 = smov 112   ;;  %s2013_s29 = smov 104   ;;  %v2141_v45 = vld [vmem:[%s2481_s1] sm:$0xff]  ;;  %v2151_v49 = vld [vmem:[%s2481_s1 + $0x8] sm:$0xff]  ;;  %v2160_v56 = vld [vmem:[%s2481_s1 + $0x18] sm:$0xff]  ;;  %vm453_vm3 = vcmask 130048  }
   0xd   :  { %1634 = vmatprep.subr.bf16.mxu0 %v2008_v7  ;;  %v2168_v62 = vld [vmem:[%s2481_s1 + $0x20] sm:$0xff]  ;;  %v2173_v63 = vld [vmem:[%s2481_s1 + $0x28] sm:$0xff]  ;;  %v2178_v3 = vld [vmem:[%s2481_s1 + $0x38] sm:$0xff]  ;;  %s2015_s15 = smov 8   ;;  %s2016_s16 = smov 24   ;;  %vm456_vm4 = vcmask 195584  }
   0xe   :  { %s2017_s17 = smov 16   ;;  %s2018_s19 = smov 64   ;;  %vm665_vm5 = vcmask 523264  }
  0x10   :  { %1635 = vmatpush3.bf16.msra.mxu0 %v1839_v8 }
  0x92   :  { %v56_v9 = vpop.xlane.xlu0 %55 }
  0x93   :  { %v61_v10 = vmul.f32 0.03125, %v56_v9  ;;  %v2186_v9 = vld [vmem:[%s2481_s1 + $0x30] sm:$0xff]  ;;  %s2014_s1 = smov 80  }
  0x95   :  { %v63_v11 = vadd.f32 1e-05, %v61_v10 }
  0x96   :  { %v59_v12 = vpop.xlane.xlu0 %58 }
  0x97   :  { %1860 = vrsqrt.f32 %v63_v11  ;;  %v62_v13 = vmul.f32 0.03125, %v59_v12 }
  0x99   :  { %v64_v14 = vadd.f32 1e-05, %v62_v13 }
  0x9b   :  { %1862 = vrsqrt.f32 %v64_v14 }
  0xa1   :  { %v1861_v15 = vpop.eup %1860 }
  0xa2   :  { %v67_v16 = vmul.f32 %v1861_v15, %v2085_v0 }
  0xa4   :  { %v75_v20 = vmul.f32 %v1499_v18, %v67_v16 }
  0xa5   :  { %v1863_v17 = vpop.eup %1862 }
  0xa6   :  { %v68_v19 = vmul.f32 %v1863_v17, %v2090_v1 }
  0xa8   :  { %v76_v21 = vmul.f32 %v1499_v18, %v68_v19 }
  0xaa   :  { %v77_v22 = vpack.c.bf16 %v76_v21, %v75_v20 }
  0xac   :  { %1637 = vmatmul.mubr.msk.bf16.vlgmr.msra.gmra.mrb[0].mxu0 %vm53_vm0, %v77_v22 }
 0x17f   :  { %v131_v23 = vpop.f32.mrb[0].mxu0 }
 0x180   :  { %v1638_v24 = vpop.f32.mrb[1].mxu0 }
 0x181   :  { %v134_v25 = vpop.f32.mrb[2].mxu0 }
 0x182   :  { %v1639_v26 = vpop.f32.mrb[3].mxu0  ;;  %v1778_v27 = vpack.i.bf16 %v134_v25, %v131_v23  ;;  %v2114_v28 = vpack.c.bf16 %v134_v25, %v131_v23 }
 0x184   :  { %1779 = vrot.lane.b32.xlu1 %v1778_v27, %s2010_s26  ;;  %1644 = vmatprep.mubr.msk.bf16.mxu1 %vm168_vm2, %v2114_v28 }
 0x188   :  { %164 = vrot.lane.b32.xlu1 %v2114_v28, %s2011_s27 }
 0x18c   :  { %1784 = vrot.lane.b32.xlu1 %v1778_v27, %s2012_s28 }
 0x190   :  { %1789 = vrot.lane.b32.xlu1 %v1778_v27, %s2013_s29 }
 0x1f6   :  { %v1780_v29 = vpop.permute.xlu1 %1779 }
 0x1f7   :  { %v1782_v30 = vunpack.i.h.bf16 %v1780_v29  ;;  %v1781_v31 = vunpack.i.l.bf16 %v1780_v29 }
 0x1f9   :  { %v2123_v32 = vpack.c.bf16 %v1782_v30, %v1781_v31 }
 0x1fa   :  { %v165_v33 = vpop.permute.xlu1 %164 }
 0x1fb   :  { %166 = vrot.lane.b32.xlu0 %v2123_v32, %s2011_s27  ;;  %1760 = vmatprep.subr.msk.bf16.mxu1 %vm168_vm2, %v165_v33  ;;  %v182_v34 = vsel %vm168_vm2, %v165_v33, 0 }
 0x1fc   :  { %1641 = vmatpush3.bf16.xpose.msra.mxu1 %v182_v34 }
 0x1fe   :  { %v1785_v36 = vpop.permute.xlu1 %1784 }
 0x1ff   :  { %v1787_v38 = vunpack.i.h.bf16 %v1785_v36  ;;  %v1786_v39 = vunpack.i.l.bf16 %v1785_v36 }
 0x201   :  { %v160_v40 = vpack.c.bf16 %v1787_v38, %v1786_v39 }
 0x202   :  { %v1790_v41 = vpop.permute.xlu1 %1789 }
 0x203   :  { %v1792_v42 = vunpack.i.h.bf16 %v1790_v41  ;;  %v1791_v43 = vunpack.i.l.bf16 %v1790_v41 }
 0x205   :  { %v161_v44 = vpack.c.bf16 %v1792_v42, %v1791_v43 }
 0x26d   :  { %v167_v35 = vpop.permute.xlu0 %166 }
 0x26e   :  { %1761 = vmatprep.subr.msk.bf16.mxu1 %vm168_vm2, %v167_v35  ;;  %v185_v37 = vsel %vm168_vm2, %v167_v35, 0 }
 0x26f   :  { %1643 = vmatpush3.bf16.xpose.msra.mxu1 %v185_v37 }
 0x270   :  { %1672 = vmatprep.subr.bf16.mxu1 %v2008_v7 }
 0x276   :  { %1645 = vmatmul.mubr.msk.bf16.vlgmr.msra.gmra.mrb[0].mxu1 %vm168_vm2, %v2123_v32 }
 0x277   :  { %1648 = vmatprep.mubr.msk.bf16.mxu1 %vm168_vm2, %v160_v40 }
 0x27e   :  { %1649 = vmatmul.mubr.msk.bf16.gmra.mrb[4].mxu1 %vm168_vm2, %v161_v44 }
 0x27f   :  { %1676 = vmatprep.mubr.msk.bf16.mxu1 %vm2009_vm1, %v2008_v7 }
 0x349   :  { %v1646_v46 = vpop.f32.mrb[0].mxu1 }
 0x34a   :  { %v221_v48 = vpop.f32.mrb[1].mxu1  ;;  %v230_v53 = vadd.f32 %v1646_v46, %v2146_v47 }
 0x34b   :  { %v222_v50 = vadd.f32 %v221_v48, %v2141_v45  ;;  %v1647_v51 = vpop.f32.mrb[2].mxu1 }
 0x34c   :  { %v224_v52 = vpop.f32.mrb[3].mxu1  ;;  %v233_v58 = vadd.f32 %v1647_v51, %v2160_v56  ;;  %v258_v60 = vsel %vm53_vm0, %v230_v53, -inf }
 0x34d   :  { %v225_v54 = vadd.f32 %v224_v52, %v2151_v49  ;;  %v252_v55 = vsel %vm53_vm0, %v222_v50, -inf }
 0x34e   :  { %253 = vmax.xlane.f32.xlu1 %v252_v55  ;;  %v261_v8 = vsel %vm53_vm0, %v233_v58, -inf }
 0x34f   :  { %v255_v57 = vsel %vm53_vm0, %v225_v54, -inf }
 0x350   :  { %256 = vmax.xlane.f32.xlu0 %v255_v57 }
 0x351   :  { %v1650_v59 = vpop.f32.mrb[4].mxu1 }
 0x352   :  { %v237_v61 = vpop.f32.mrb[5].mxu1  ;;  %259 = vmax.xlane.f32.xlu1 %v258_v60  ;;  %v246_v12 = vadd.f32 %v1650_v59, %v2186_v9 }
 0x353   :  { %v1651_v2 = vpop.f32.mrb[6].mxu1  ;;  %v238_v5 = vadd.f32 %v237_v61, %v2168_v62 }
 0x354   :  { %v240_v4 = vpop.f32.mrb[7].mxu1  ;;  %v249_v10 = vadd.f32 %v1651_v2, %v2178_v3  ;;  %v270_v15 = vsel %vm53_vm0, %v246_v12, -inf }
 0x355   :  { %v241_v6 = vadd.f32 %v240_v4, %v2173_v63  ;;  %v264_v13 = vsel %vm53_vm0, %v238_v5, -inf }
 0x356   :  { %262 = vmax.xlane.f32.xlu1 %v261_v8  ;;  %v273_v14 = vsel %vm53_vm0, %v249_v10, -inf }
 0x357   :  { %v267_v11 = vsel %vm53_vm0, %v241_v6, -inf }
 0x358   :  { %268 = vmax.xlane.f32.xlu0 %v267_v11 }
 0x35a   :  { %265 = vmax.xlane.f32.xlu1 %v264_v13 }
 0x35c   :  { %274 = vmax.xlane.f32.xlu0 %v273_v14 }
 0x35e   :  { %271 = vmax.xlane.f32.xlu1 %v270_v15 }
 0x3db   :  { %v254_v16 = vpop.xlane.xlu1 %253 }
 0x3dc   :  { %v276_v17 = vsub.f32 %v222_v50, %v254_v16 }
 0x3dd   :  { %v257_v18 = vpop.xlane.xlu0 %256 }
 0x3de   :  { %v284_v21 = vmul.f32 1.442695, %v276_v17  ;;  %v277_v22 = vsub.f32 %v225_v54, %v257_v18 }
 0x3df   :  { %v260_v19 = vpop.xlane.xlu1 %259 }
 0x3e0   :  { %v278_v20 = vsub.f32 %v230_v53, %v260_v19  ;;  %v286_v27 = vmul.f32 1.442695, %v277_v22 }
 0x3e2   :  { %v288_v23 = vmul.f32 1.442695, %v278_v20 }
 0x3e3   :  { %v263_v24 = vpop.xlane.xlu1 %262 }
 0x3e4   :  { %1864 = vpow2.f32 %v288_v23  ;;  %v279_v25 = vsub.f32 %v233_v58, %v263_v24 }
 0x3e5   :  { %v269_v26 = vpop.xlane.xlu0 %268  ;;  %1866 = vpow2.f32 %v284_v21 }
 0x3e6   :  { %v290_v29 = vmul.f32 1.442695, %v279_v25  ;;  %v281_v31 = vsub.f32 %v241_v6, %v269_v26 }
 0x3e7   :  { %v266_v30 = vpop.xlane.xlu1 %265 }
 0x3e8   :  { %1868 = vpow2.f32 %v290_v29  ;;  %v280_v34 = vsub.f32 %v238_v5, %v266_v30  ;;  %v294_v39 = vmul.f32 1.442695, %v281_v31 }
 0x3e9   :  { %v275_v33 = vpop.xlane.xlu0 %274  ;;  %1870 = vpow2.f32 %v286_v27 }
 0x3ea   :  { %v283_v35 = vsub.f32 %v249_v10, %v275_v33  ;;  %v292_v41 = vmul.f32 1.442695, %v280_v34 }
 0x3eb   :  { %v272_v36 = vpop.xlane.xlu1 %271 }
 0x3ec   :  { %v298_v37 = vmul.f32 1.442695, %v283_v35  ;;  %v282_v38 = vsub.f32 %v246_v12, %v272_v36  ;;  %v1840_v35 = vld [vmem:[%s2483_s3] sm:$0xff]  }
 0x3ee   :  { %v2194_v40 = vpop.eup %1864  ;;  %1872 = vpow2.f32 %v298_v37  ;;  %v296_v42 = vmul.f32 1.442695, %v282_v38  ;;  %v1841_v37 = vld [vmem:[%s2483_s3 + $0x8] sm:$0xff]  }
 0x3ef   :  { %v306_v43 = vsel %vm53_vm0, %v2194_v40, 0.0  ;;  %v1867_v44 = vpop.eup %1866 }
 0x3f0   :  { %1874 = vpow2.f32 %v296_v42  ;;  %307 = vadd.xlane.f32.xlu1 %v306_v43  ;;  %v300_v48 = vsel %vm53_vm0, %v1867_v44, 0.0 }
 0x3f1   :  { %1876 = vpow2.f32 %v294_v39 }
 0x3f2   :  { %v1869_v46 = vpop.eup %1868  ;;  %1878 = vpow2.f32 %v292_v41 }
 0x3f3   :  { %v309_v50 = vsel %vm53_vm0, %v1869_v46, 0.0  ;;  %v1871_v51 = vpop.eup %1870 }
 0x3f4   :  { %301 = vadd.xlane.f32.xlu1 %v300_v48  ;;  %310 = vadd.xlane.f32.xlu0 %v309_v50  ;;  %v303_v52 = vsel %vm53_vm0, %v1871_v51, 0.0 }
 0x3f8   :  { %v1873_v53 = vpop.eup %1872  ;;  %304 = vadd.xlane.f32.xlu0 %v303_v52 }
 0x3f9   :  { %v321_v57 = vsel %vm53_vm0, %v1873_v53, 0.0 }
 0x3fa   :  { %v1875_v54 = vpop.eup %1874 }
 0x3fb   :  { %v1877_v55 = vpop.eup %1876  ;;  %v318_v58 = vsel %vm53_vm0, %v1875_v54, 0.0 }
 0x3fc   :  { %v1879_v59 = vpop.eup %1878  ;;  %322 = vadd.xlane.f32.xlu0 %v321_v57  ;;  %319 = vadd.xlane.f32.xlu1 %v318_v58  ;;  %v315_v60 = vsel %vm53_vm0, %v1877_v55, 0.0 }
 0x3fd   :  { %v312_v61 = vsel %vm53_vm0, %v1879_v59, 0.0 }
 0x400   :  { %316 = vadd.xlane.f32.xlu0 %v315_v60  ;;  %313 = vadd.xlane.f32.xlu1 %v312_v61 }
 0x411   :  { %344 = vrot.lane.b32.xlu1 %v2114_v28, %s2014_s1 }
 0x416   :  { %346 = vrot.lane.b32.xlu0 %v2123_v32, %s2014_s1 }
 0x47d   :  { %v308_v2 = vpop.xlane.xlu1 %307 }
 0x481   :  { %v311_v4 = vpop.xlane.xlu0 %310  ;;  %v302_v5 = vpop.xlane.xlu1 %301 }
 0x482   :  { %1880 = vrcp.f32 %v302_v5 }
 0x485   :  { %v305_v6 = vpop.xlane.xlu0 %304 }
 0x486   :  { %1882 = vrcp.f32 %v305_v6 }
 0x487   :  { %1884 = vrcp.f32 %v311_v4 }
 0x488   :  { %1886 = vrcp.f32 %v308_v2 }
 0x489   :  { %v323_v8 = vpop.xlane.xlu0 %322  ;;  %v320_v10 = vpop.xlane.xlu1 %319 }
 0x48a   :  { %1888 = vrcp.f32 %v323_v8 }
 0x48b   :  { %1890 = vrcp.f32 %v320_v10 }
 0x48c   :  { %v1881_v13 = vpop.eup %1880 }
 0x48d   :  { %v317_v11 = vpop.xlane.xlu0 %316  ;;  %v314_v12 = vpop.xlane.xlu1 %313  ;;  %v332_v15 = vmul.f32 %v1881_v13, %v1867_v44 }
 0x48e   :  { %1892 = vrcp.f32 %v317_v11 }
 0x48f   :  { %1894 = vrcp.f32 %v314_v12 }
 0x490   :  { %v1883_v28 = vpop.eup %1882 }
 0x491   :  { %v1885_v14 = vpop.eup %1884  ;;  %v345_v32 = vpop.permute.xlu1 %344  ;;  %v333_v16 = vmul.f32 %v1883_v28, %v1871_v51 }
 0x492   :  { %1652 = vmatprep.subr.bf16.mxu0 %v345_v32  ;;  %v1887_v17 = vpop.eup %1886  ;;  %v347_v18 = vpop.permute.xlu0 %346  ;;  %v335_v20 = vmul.f32 %v1885_v14, %v1869_v46 }
 0x493   :  { %1653 = vmatpush3.bf16.msra.mxu0 %v345_v32  ;;  %v340_v19 = vpack.c.bf16 %v333_v16, %v332_v15  ;;  %v334_v22 = vmul.f32 %v1887_v17, %v2194_v40 }
 0x494   :  { %1654 = vmatprep.subr.bf16.mxu0 %v347_v18  ;;  %v1889_v21 = vpop.eup %1888 }
 0x495   :  { %1656 = vmatprep.mubr.msk.bf16.mxu0 %vm53_vm0, %v340_v19  ;;  %v1891_v23 = vpop.eup %1890  ;;  %v341_v25 = vpack.c.bf16 %v335_v20, %v334_v22  ;;  %v339_v33 = vmul.f32 %v1889_v21, %v1873_v53 }
 0x496   :  { %v338_v31 = vmul.f32 %v1891_v23, %v1875_v54 }
 0x497   :  { %1655 = vmatpush3.bf16.msra.mxu0 %v347_v18 }
 0x498   :  { %v1893_v24 = vpop.eup %1892  ;;  %1664 = vmatprep.subr.bf16.mxu0 %v2008_v7  ;;  %v343_v34 = vpack.c.bf16 %v339_v33, %v338_v31 }
 0x499   :  { %v1895_v26 = vpop.eup %1894  ;;  %v337_v27 = vmul.f32 %v1893_v24, %v1877_v55 }
 0x49a   :  { %1657 = vmatmul.mubr.msk.bf16.vlgmr.msra.gmra.mrb[4].mxu0 %vm53_vm0, %v341_v25  ;;  %v336_v29 = vmul.f32 %v1895_v26, %v1879_v59 }
 0x49b   :  { %1665 = vmatpush3.bf16.msra.mxu0 %v1840_v35  ;;  %v1844_v35 = vld [vmem:[%s2487_s7] sm:$0xff]  }
 0x49c   :  { %v342_v30 = vpack.c.bf16 %v337_v27, %v336_v29  ;;  %1666 = vmatprep.subr.bf16.mxu0 %v2008_v7  ;;  %v1514_v29 = vld [vmem:[%s2485_s5] ss:$0 sm:$0xff] }
 0x49e   :  { %1660 = vmatprep.mubr.msk.bf16.mxu0 %vm53_vm0, %v342_v30 }
 0x49f   :  { %1667 = vmatpush3.bf16.msra.mxu0 %v1841_v37  ;;  %v1846_v37 = vld [vmem:[%s2487_s7 + $0x10] sm:$0xff]  }
 0x4a0   :  { %1680 = vmatprep.subr.bf16.mxu0 %v2008_v7 }
 0x4a2   :  { %1661 = vmatmul.mubr.msk.bf16.gmra.mrb[8].mxu0 %vm53_vm0, %v343_v34 }
 0x4a3   :  { %1668 = vmatprep.mubr.msk.bf16.mxu0 %vm2009_vm1, %v2008_v7 }
 0x56d   :  { %v1658_v36 = vpop.f32.mrb[4].mxu0 }
 0x56e   :  { %v396_v38 = vpop.f32.mrb[5].mxu0 }
 0x56f   :  { %v1659_v39 = vpop.f32.mrb[6].mxu0 }
 0x570   :  { %v1793_v40 = vpack.i.bf16 %v1659_v39, %v1658_v36  ;;  %v399_v41 = vpop.f32.mrb[7].mxu0  ;;  %v1845_v36 = vld [vmem:[%s2487_s7 + $0x8] sm:$0xff]  }
 0x572   :  { %1794 = vrot.lane.b32.xlu1 %v1793_v40, %s2015_s15 }
 0x575   :  { %v1662_v42 = vpop.f32.mrb[8].mxu0 }
 0x576   :  { %v412_v43 = vpop.f32.mrb[9].mxu0 }
 0x577   :  { %v1663_v44 = vpop.f32.mrb[10].mxu0 }
 0x578   :  { %v1803_v46 = vpack.i.bf16 %v1663_v44, %v1662_v42  ;;  %v415_v48 = vpop.f32.mrb[11].mxu0 }
 0x579   :  { %v1798_v50 = vpack.i.bf16 %v415_v48, %v412_v43 }
 0x57a   :  { %1804 = vrot.lane.b32.xlu0 %v1803_v46, %s2016_s16 }
 0x57b   :  { %1799 = vrot.lane.b32.xlu1 %v1798_v50, %s2017_s17 }
 0x5e4   :  { %v1795_v51 = vpop.permute.xlu1 %1794 }
 0x5e5   :  { %v1797_v52 = vunpack.i.h.bf16 %v1795_v51  ;;  %v1796_v53 = vunpack.i.l.bf16 %v1795_v51 }
 0x5e7   :  { %v451_v59 = vsel %vm168_vm2, %v396_v38, %v1796_v53  ;;  %v452_v60 = vsel %vm168_vm2, %v399_v41, %v1797_v52  ;;  %v1847_v38 = vld [vmem:[%s2487_s7 + $0x18] sm:$0xff]  }
 0x5ec   :  { %v1805_v54 = vpop.permute.xlu0 %1804 }
 0x5ed   :  { %v1800_v55 = vpop.permute.xlu1 %1799  ;;  %v1807_v61 = vunpack.i.h.bf16 %v1805_v54  ;;  %v1806_v2 = vunpack.i.l.bf16 %v1805_v54 }
 0x5ee   :  { %v1802_v57 = vunpack.i.h.bf16 %v1800_v55  ;;  %v1801_v58 = vunpack.i.l.bf16 %v1800_v55 }
 0x5f0   :  { %v455_v4 = vsel %vm453_vm3, %v452_v60, %v1802_v57  ;;  %v454_v5 = vsel %vm453_vm3, %v451_v59, %v1801_v58 }
 0x5f1   :  { %v458_v6 = vsel %vm456_vm4, %v455_v4, %v1807_v61  ;;  %v457_v8 = vsel %vm456_vm4, %v454_v5, %v1806_v2 }
 0x5f2   :  { %v459_v10 = vpack.c.bf16 %v458_v6, %v457_v8 }
 0x5f4   :  { %1669 = vmatmul.mubr.msk.bf16.vlgmr.msra.gmra.mrb[12].mxu0 %vm53_vm0, %v459_v10 }
 0x5f5   :  { %1688 = vmatprep.mubr.msk.bf16.mxu0 %vm2009_vm1, %v2008_v7  ;;  %1681 = vmatpush3.bf16.msra.mxu0 %v1844_v35 }
 0x5f6   :  { %1682 = vmatprep.subr.bf16.mxu0 %v2008_v7 }
 0x5f9   :  { %1683 = vmatpush3.bf16.msra.mxu0 %v1845_v36 }
 0x5fa   :  { %1684 = vmatprep.subr.bf16.mxu0 %v2008_v7 }
 0x5fd   :  { %1685 = vmatpush3.bf16.msra.mxu0 %v1846_v37 }
 0x5fe   :  { %1686 = vmatprep.subr.bf16.mxu0 %v2008_v7 }
 0x601   :  { %1687 = vmatpush3.bf16.msra.mxu0 %v1847_v38 }
 0x6c7   :  { %v513_v11 = vpop.f32.mrb[12].mxu0 }
 0x6c8   :  { %v2238_v12 = vadd.f32 %v513_v11, %v2085_v0  ;;  %v1670_v13 = vpop.f32.mrb[13].mxu0  ;;  %v1842_v0 = vld [vmem:[%s2486_s6] sm:$0xff]  }
 0x6c9   :  { %v516_v28 = vpop.f32.mrb[14].mxu0  ;;  %1673 = vmatpush3.bf16.msra.mxu1 %v1842_v0 }
 0x6ca   :  { %v2241_v14 = vadd.f32 %v516_v28, %v2090_v1  ;;  %v1671_v32 = vpop.f32.mrb[15].mxu0  ;;  %v523_v15 = vmul.f32 %v2238_v12, %v2238_v12  ;;  %1674 = vmatprep.subr.bf16.mxu1 %v2008_v7  ;;  %v1843_v1 = vld [vmem:[%s2486_s6 + $0x8] sm:$0xff]  }
 0x6cb   :  { %v1849_v32 = vld [vmem:[%s2482_s2 + $0x18] sm:$0xff]  }
 0x6cc   :  { %v525_v16 = vsel %vm53_vm0, %v523_v15, 0.0  ;;  %v524_v17 = vmul.f32 %v2241_v14, %v2241_v14 }
 0x6cd   :  { %526 = vadd.xlane.f32.xlu1 %v525_v16  ;;  %1675 = vmatpush3.bf16.msra.mxu1 %v1843_v1 }
 0x6ce   :  { %v528_v18 = vsel %vm53_vm0, %v524_v17, 0.0  ;;  %1692 = vmatprep.subr.bf16.mxu1 %v2008_v7 }
 0x6cf   :  { %529 = vadd.xlane.f32.xlu0 %v528_v18 }
 0x75a   :  { %v527_v19 = vpop.xlane.xlu1 %526 }
 0x75b   :  { %v531_v20 = vmul.f32 0.03125, %v527_v19 }
 0x75c   :  { %v530_v21 = vpop.xlane.xlu0 %529 }
 0x75d   :  { %v533_v22 = vadd.f32 1e-05, %v531_v20  ;;  %v532_v23 = vmul.f32 0.03125, %v530_v21 }
 0x75f   :  { %1896 = vrsqrt.f32 %v533_v22  ;;  %v534_v24 = vadd.f32 1e-05, %v532_v23  ;;  %v1526_v22 = vld [vmem:[%s2484_s4 + $0x1] ss:$0 sm:$0xff] }
 0x761   :  { %1898 = vrsqrt.f32 %v534_v24 }
 0x769   :  { %v1897_v25 = vpop.eup %1896 }
 0x76a   :  { %v537_v26 = vmul.f32 %v1897_v25, %v2238_v12 }
 0x76b   :  { %v1899_v27 = vpop.eup %1898 }
 0x76c   :  { %v538_v30 = vmul.f32 %v1899_v27, %v2241_v14  ;;  %v545_v31 = vmul.f32 %v1514_v29, %v537_v26 }
 0x76e   :  { %v546_v33 = vmul.f32 %v1514_v29, %v538_v30 }
 0x770   :  { %v547_v34 = vpack.c.bf16 %v546_v33, %v545_v31 }
 0x772   :  { %1677 = vmatmul.mubr.msk.bf16.vlgmr.msra.gmra.mrb[8].mxu1 %vm53_vm0, %v547_v34 }
 0x773   :  { %1696 = vmatprep.mubr.msk.bf16.mxu1 %vm2009_vm1, %v2008_v7 }
 0x845   :  { %v601_v39 = vpop.f32.mrb[8].mxu1 }
 0x846   :  { %624 = vrot.lane.b32.xlu0 %v601_v39, %s2018_s19  ;;  %v1678_v40 = vpop.f32.mrb[9].mxu1  ;;  %v1518_v43 = vmul.f32 -1.442695, %v601_v39 }
 0x847   :  { %v604_v41 = vpop.f32.mrb[10].mxu1 }
 0x848   :  { %626 = vrot.lane.b32.xlu1 %v604_v41, %s2018_s19  ;;  %v1679_v42 = vpop.f32.mrb[11].mxu1  ;;  %v1519_v44 = vmul.f32 -1.442695, %v604_v41  ;;  %1900 = vpow2.f32 %v1518_v43 }
 0x84a   :  { %1902 = vpow2.f32 %v1519_v44 }
 0x852   :  { %v1901_v46 = vpop.eup %1900 }
 0x853   :  { %v614_v50 = vadd.f32 1.0, %v1901_v46 }
 0x854   :  { %v1903_v48 = vpop.eup %1902 }
 0x855   :  { %v615_v51 = vadd.f32 1.0, %v1903_v48  ;;  %1904 = vrcp.f32 %v614_v50 }
 0x857   :  { %1906 = vrcp.f32 %v615_v51 }
 0x85f   :  { %v1905_v52 = vpop.eup %1904 }
 0x860   :  { %v620_v55 = vmul.f32 %v1905_v52, %v601_v39 }
 0x861   :  { %v1907_v53 = vpop.eup %1906 }
 0x862   :  { %v621_v57 = vmul.f32 %v1907_v53, %v604_v41 }
 0x8b8   :  { %v625_v54 = vpop.permute.xlu0 %624 }
 0x8b9   :  { %v630_v59 = vmul.f32 %v625_v54, %v620_v55 }
 0x8ba   :  { %v627_v58 = vpop.permute.xlu1 %626 }
 0x8bb   :  { %v631_v60 = vmul.f32 %v627_v58, %v621_v57 }
 0x8bd   :  { %v632_v61 = vpack.c.bf16 %v631_v60, %v630_v59 }
 0x8bf   :  { %1689 = vmatmul.mubr.msk.bf16.vlgmr.msra.gmra.mrb[16].mxu0 %vm665_vm5, %v632_v61 }
 0x992   :  { %v703_v2 = vpop.f32.mrb[16].mxu0 }
 0x993   :  { %v2284_v4 = vadd.f32 %v703_v2, %v2238_v12  ;;  %v1690_v5 = vpop.f32.mrb[17].mxu0 }
 0x994   :  { %v706_v6 = vpop.f32.mrb[18].mxu0 }
 0x995   :  { %712 = vst.msk [vmem:[#allocation4] sm:$0xff] %vm53_vm0, %v2284_v4  ;;  %v2289_v8 = vadd.f32 %v706_v6, %v2241_v14  ;;  %v1691_v10 = vpop.f32.mrb[19].mxu0  ;;  %v716_v11 = vmul.f32 %v2284_v4, %v2284_v4  ;;  %v1848_v14 = vld [vmem:[%s2482_s2 + $0x10] sm:$0xff]  }
 0x996   :  { %1693 = vmatpush3.bf16.msra.mxu1 %v1848_v14 }
 0x997   :  { %713 = vst.msk [vmem:[#allocation4 + $0x8] sm:$0xff] %vm53_vm0, %v2289_v8  ;;  %v718_v13 = vsel %vm53_vm0, %v716_v11, 0.0  ;;  %v717_v12 = vmul.f32 %v2289_v8, %v2289_v8  ;;  %1694 = vmatprep.subr.bf16.mxu1 %v2008_v7 }
 0x998   :  { %719 = vadd.xlane.f32.xlu1 %v718_v13 }
 0x999   :  { %v721_v28 = vsel %vm53_vm0, %v717_v12, 0.0 }
 0x99a   :  { %722 = vadd.xlane.f32.xlu0 %v721_v28  ;;  %1695 = vmatpush3.bf16.msra.mxu1 %v1849_v32 }
 0xa25   :  { %v720_v15 = vpop.xlane.xlu1 %719 }
 0xa26   :  { %v724_v16 = vmul.f32 0.03125, %v720_v15 }
 0xa27   :  { %v723_v17 = vpop.xlane.xlu0 %722 }
 0xa28   :  { %v726_v18 = vadd.f32 1e-05, %v724_v16  ;;  %v725_v0 = vmul.f32 0.03125, %v723_v17 }
 0xa2a   :  { %1908 = vrsqrt.f32 %v726_v18  ;;  %v727_v1 = vadd.f32 1e-05, %v725_v0 }
 0xa2c   :  { %1910 = vrsqrt.f32 %v727_v1 }
 0xa34   :  { %v1909_v19 = vpop.eup %1908 }
 0xa35   :  { %v730_v20 = vmul.f32 %v1909_v19, %v2284_v4 }
 0xa36   :  { %v1911_v21 = vpop.eup %1910 }
 0xa37   :  { %v731_v23 = vmul.f32 %v1911_v21, %v2289_v8  ;;  %v738_v24 = vmul.f32 %v1526_v22, %v730_v20 }
 0xa39   :  { %v739_v25 = vmul.f32 %v1526_v22, %v731_v23 }
 0xa3b   :  { %v740_v26 = vpack.c.bf16 %v739_v25, %v738_v24 }
 0xa3d   :  { %1697 = vmatmul.mubr.msk.bf16.vlgmr.msra.gmra.mrb[12].mxu1 %vm53_vm0, %v740_v26 }
 0xb10   :  { %v795_v27 = vpop.f32.mrb[12].mxu1 }
 0xb11   :  { %v1698_v29 = vpop.f32.mrb[13].mxu1 }
 0xb12   :  { %v798_v30 = vpop.f32.mrb[14].mxu1 }
 0xb13   :  { %v1699_v31 = vpop.f32.mrb[15].mxu1  ;;  %v1808_v33 = vpack.i.bf16 %v798_v30, %v795_v27  ;;  %v2312_v34 = vpack.c.bf16 %v798_v30, %v795_v27 }
 0xb15   :  { %1809 = vrot.lane.b32.xlu0 %v1808_v33, %s2010_s26  ;;  %828 = vrot.lane.b32.xlu1 %v2312_v34, %s2011_s27 }
 0xb16   :  { %1704 = vmatprep.mubr.msk.bf16.mxu1 %vm168_vm2, %v2312_v34 }
 0xb19   :  { %1814 = vrot.lane.b32.xlu0 %v1808_v33, %s2012_s28 }
 0xb87   :  { %v1810_v35 = vpop.permute.xlu0 %1809  ;;  %v829_v36 = vpop.permute.xlu1 %828 }
 0xb88   :  { %v1812_v37 = vunpack.i.h.bf16 %v1810_v35  ;;  %v1811_v38 = vunpack.i.l.bf16 %v1810_v35  ;;  %v845_v39 = vsel %vm168_vm2, %v829_v36, 0  ;;  %1762 = vmatprep.subr.msk.bf16.mxu1 %vm168_vm2, %v829_v36 }
 0xb89   :  { %1701 = vmatpush3.bf16.xpose.msra.mxu1 %v845_v39 }
 0xb8a   :  { %v2322_v40 = vpack.c.bf16 %v1812_v37, %v1811_v38 }
 0xb8b   :  { %v1815_v42 = vpop.permute.xlu0 %1814 }
 0xb8c   :  { %830 = vrot.lane.b32.xlu1 %v2322_v40, %s2011_s27  ;;  %v1817_v44 = vunpack.i.h.bf16 %v1815_v42  ;;  %v1816_v46 = vunpack.i.l.bf16 %v1815_v42 }
 0xb8e   :  { %v824_v48 = vpack.c.bf16 %v1817_v44, %v1816_v46 }
 0xb90   :  { %1819 = vrot.lane.b32.xlu1 %v1808_v33, %s2013_s29 }
 0xbfe   :  { %v831_v41 = vpop.permute.xlu1 %830 }
 0xbff   :  { %v848_v43 = vsel %vm168_vm2, %v831_v41, 0  ;;  %1763 = vmatprep.subr.msk.bf16.mxu1 %vm168_vm2, %v831_v41 }
 0xc00   :  { %1703 = vmatpush3.bf16.xpose.msra.mxu1 %v848_v43 }
 0xc01   :  { %1732 = vmatprep.subr.bf16.mxu1 %v2008_v7 }
 0xc02   :  { %v1820_v50 = vpop.permute.xlu1 %1819 }
 0xc03   :  { %v1822_v51 = vunpack.i.h.bf16 %v1820_v50  ;;  %v1821_v52 = vunpack.i.l.bf16 %v1820_v50 }
 0xc05   :  { %v825_v53 = vpack.c.bf16 %v1822_v51, %v1821_v52 }
 0xc07   :  { %1705 = vmatmul.mubr.msk.bf16.vlgmr.msra.gmra.mrb[16].mxu1 %vm168_vm2, %v2322_v40 }
 0xc08   :  { %1708 = vmatprep.mubr.msk.bf16.mxu1 %vm168_vm2, %v824_v48 }
 0xc0f   :  { %1709 = vmatmul.mubr.msk.bf16.gmra.mrb[20].mxu1 %vm168_vm2, %v825_v53 }
 0xc10   :  { %1736 = vmatprep.mubr.msk.bf16.mxu1 %vm2009_vm1, %v2008_v7 }
 0xcda   :  { %v1706_v54 = vpop.f32.mrb[16].mxu1 }
 0xcdb   :  { %v884_v55 = vpop.f32.mrb[17].mxu1  ;;  %v893_v60 = vadd.f32 %v1706_v54, %v2146_v47 }
 0xcdc   :  { %v885_v57 = vadd.f32 %v884_v55, %v2141_v45  ;;  %v1707_v58 = vpop.f32.mrb[18].mxu1 }
 0xcdd   :  { %v887_v59 = vpop.f32.mrb[19].mxu1  ;;  %v896_v6 = vadd.f32 %v1707_v58, %v2160_v56  ;;  %v921_v11 = vsel %vm53_vm0, %v893_v60, -inf }
 0xcde   :  { %v888_v61 = vadd.f32 %v887_v59, %v2151_v49  ;;  %v915_v2 = vsel %vm53_vm0, %v885_v57, -inf }
 0xcdf   :  { %916 = vmax.xlane.f32.xlu0 %v915_v2  ;;  %v924_v32 = vsel %vm53_vm0, %v896_v6, -inf }
 0xce0   :  { %v918_v5 = vsel %vm53_vm0, %v888_v61, -inf }
 0xce1   :  { %919 = vmax.xlane.f32.xlu1 %v918_v5 }
 0xce2   :  { %v1710_v10 = vpop.f32.mrb[20].mxu1 }
 0xce3   :  { %v900_v13 = vpop.f32.mrb[21].mxu1  ;;  %922 = vmax.xlane.f32.xlu0 %v921_v11  ;;  %v909_v47 = vadd.f32 %v1710_v10, %v2186_v9 }
 0xce4   :  { %v901_v45 = vadd.f32 %v900_v13, %v2168_v62  ;;  %v1711_v12 = vpop.f32.mrb[22].mxu1 }
 0xce5   :  { %v903_v28 = vpop.f32.mrb[23].mxu1  ;;  %v912_v56 = vadd.f32 %v1711_v12, %v2178_v3  ;;  %v933_v15 = vsel %vm53_vm0, %v909_v47, -inf }
 0xce6   :  { %v904_v49 = vadd.f32 %v903_v28, %v2173_v63  ;;  %v927_v14 = vsel %vm53_vm0, %v901_v45, -inf }
 0xce7   :  { %928 = vmax.xlane.f32.xlu1 %v927_v14  ;;  %925 = vmax.xlane.f32.xlu0 %v924_v32  ;;  %v936_v62 = vsel %vm53_vm0, %v912_v56, -inf }
 0xce8   :  { %v930_v16 = vsel %vm53_vm0, %v904_v49, -inf }
 0xceb   :  { %934 = vmax.xlane.f32.xlu1 %v933_v15  ;;  %931 = vmax.xlane.f32.xlu0 %v930_v16 }
 0xcef   :  { %937 = vmax.xlane.f32.xlu0 %v936_v62 }
 0xd6c   :  { %v917_v9 = vpop.xlane.xlu0 %916 }
 0xd6d   :  { %v939_v17 = vsub.f32 %v885_v57, %v917_v9 }
 0xd6e   :  { %v920_v63 = vpop.xlane.xlu1 %919 }
 0xd6f   :  { %v947_v1 = vmul.f32 1.442695, %v939_v17  ;;  %v940_v20 = vsub.f32 %v888_v61, %v920_v63 }
 0xd70   :  { %v923_v18 = vpop.xlane.xlu0 %922 }
 0xd71   :  { %v941_v0 = vsub.f32 %v893_v60, %v923_v18  ;;  %v949_v25 = vmul.f32 1.442695, %v940_v20 }
 0xd73   :  { %v951_v19 = vmul.f32 1.442695, %v941_v0 }
 0xd74   :  { %v929_v21 = vpop.xlane.xlu1 %928  ;;  %v926_v22 = vpop.xlane.xlu0 %925 }
 0xd75   :  { %1912 = vpow2.f32 %v951_v19  ;;  %v942_v3 = vsub.f32 %v896_v6, %v926_v22  ;;  %v943_v23 = vsub.f32 %v901_v45, %v929_v21  ;;  %v1850_v22 = vld [vmem:[%s2483_s3 + $0x10] sm:$0xff]  }
 0xd76   :  { %1914 = vpow2.f32 %v947_v1 }
 0xd77   :  { %v953_v24 = vmul.f32 1.442695, %v942_v3  ;;  %v955_v30 = vmul.f32 1.442695, %v943_v23  ;;  %v1851_v23 = vld [vmem:[%s2483_s3 + $0x18] sm:$0xff]  }
 0xd78   :  { %v935_v26 = vpop.xlane.xlu1 %934  ;;  %v932_v27 = vpop.xlane.xlu0 %931 }
 0xd79   :  { %v945_v29 = vsub.f32 %v909_v47, %v935_v26  ;;  %1916 = vpow2.f32 %v953_v24  ;;  %v944_v33 = vsub.f32 %v904_v49, %v932_v27 }
 0xd7a   :  { %1918 = vpow2.f32 %v949_v25 }
 0xd7b   :  { %v959_v31 = vmul.f32 1.442695, %v945_v29  ;;  %v957_v39 = vmul.f32 1.442695, %v944_v33 }
 0xd7c   :  { %v938_v35 = vpop.xlane.xlu0 %937 }
 0xd7d   :  { %1920 = vpow2.f32 %v959_v31  ;;  %v946_v36 = vsub.f32 %v912_v56, %v938_v35 }
 0xd7e   :  { %1922 = vpow2.f32 %v955_v30 }
 0xd7f   :  { %v1913_v37 = vpop.eup %1912  ;;  %v961_v38 = vmul.f32 1.442695, %v946_v36 }
 0xd80   :  { %v969_v41 = vsel %vm53_vm0, %v1913_v37, 0.0  ;;  %v1915_v42 = vpop.eup %1914 }
 0xd81   :  { %1924 = vpow2.f32 %v961_v38  ;;  %970 = vadd.xlane.f32.xlu1 %v969_v41  ;;  %v963_v44 = vsel %vm53_vm0, %v1915_v42, 0.0 }
 0xd82   :  { %1926 = vpow2.f32 %v957_v39 }
 0xd83   :  { %v1917_v43 = vpop.eup %1916 }
 0xd84   :  { %v972_v46 = vsel %vm53_vm0, %v1917_v43, 0.0  ;;  %v1919_v48 = vpop.eup %1918 }
 0xd85   :  { %964 = vadd.xlane.f32.xlu1 %v963_v44  ;;  %973 = vadd.xlane.f32.xlu0 %v972_v46  ;;  %v966_v53 = vsel %vm53_vm0, %v1919_v48, 0.0 }
 0xd87   :  { %v1921_v50 = vpop.eup %1920 }
 0xd88   :  { %v981_v51 = vsel %vm53_vm0, %v1921_v50, 0.0  ;;  %v1923_v52 = vpop.eup %1922 }
 0xd89   :  { %982 = vadd.xlane.f32.xlu1 %v981_v51  ;;  %967 = vadd.xlane.f32.xlu0 %v966_v53  ;;  %v975_v55 = vsel %vm53_vm0, %v1923_v52, 0.0 }
 0xd8b   :  { %v1925_v54 = vpop.eup %1924 }
 0xd8c   :  { %v984_v57 = vsel %vm53_vm0, %v1925_v54, 0.0  ;;  %v1927_v58 = vpop.eup %1926 }
 0xd8d   :  { %976 = vadd.xlane.f32.xlu1 %v975_v55  ;;  %985 = vadd.xlane.f32.xlu0 %v984_v57  ;;  %v978_v59 = vsel %vm53_vm0, %v1927_v58, 0.0 }
 0xd91   :  { %979 = vadd.xlane.f32.xlu0 %v978_v59 }
 0xd9e   :  { %1007 = vrot.lane.b32.xlu1 %v2312_v34, %s2014_s1 }
 0xda7   :  { %1009 = vrot.lane.b32.xlu0 %v2322_v40, %s2014_s1 }
 0xe0e   :  { %v971_v60 = vpop.xlane.xlu1 %970 }
 0xe12   :  { %v965_v61 = vpop.xlane.xlu1 %964  ;;  %v974_v2 = vpop.xlane.xlu0 %973 }
 0xe13   :  { %1928 = vrcp.f32 %v974_v2 }
 0xe14   :  { %1930 = vrcp.f32 %v965_v61 }
 0xe15   :  { %1932 = vrcp.f32 %v971_v60 }
 0xe16   :  { %v983_v5 = vpop.xlane.xlu1 %982  ;;  %v968_v6 = vpop.xlane.xlu0 %967 }
 0xe17   :  { %1934 = vrcp.f32 %v968_v6 }
 0xe1a   :  { %v977_v10 = vpop.xlane.xlu1 %976  ;;  %v986_v11 = vpop.xlane.xlu0 %985 }
 0xe1b   :  { %1936 = vrcp.f32 %v986_v11 }
 0xe1c   :  { %1938 = vrcp.f32 %v977_v10 }
 0xe1d   :  { %v1929_v45 = vpop.eup %1928  ;;  %1940 = vrcp.f32 %v983_v5 }
 0xe1e   :  { %v1008_v13 = vpop.permute.xlu1 %1007  ;;  %v980_v34 = vpop.xlane.xlu0 %979  ;;  %v998_v47 = vmul.f32 %v1929_v45, %v1917_v43 }
 0xe1f   :  { %1712 = vmatprep.subr.bf16.mxu0 %v1008_v13  ;;  %v1931_v12 = vpop.eup %1930  ;;  %1942 = vrcp.f32 %v980_v34 }
 0xe20   :  { %1713 = vmatpush3.bf16.msra.mxu0 %v1008_v13  ;;  %v1933_v40 = vpop.eup %1932  ;;  %v995_v14 = vmul.f32 %v1931_v12, %v1915_v42 }
 0xe21   :  { %v1935_v28 = vpop.eup %1934  ;;  %v997_v56 = vmul.f32 %v1933_v40, %v1913_v37 }
 0xe22   :  { %v1010_v49 = vpop.permute.xlu0 %1009  ;;  %v996_v32 = vmul.f32 %v1935_v28, %v1919_v48 }
 0xe23   :  { %1714 = vmatprep.subr.bf16.mxu0 %v1010_v49  ;;  %v1004_v16 = vpack.c.bf16 %v998_v47, %v997_v56  ;;  %v1550_v56 = vld [vmem:[%s2485_s5 + $0x1] ss:$0 sm:$0xff] }
 0xe24   :  { %1715 = vmatpush3.bf16.msra.mxu0 %v1010_v49  ;;  %v1003_v15 = vpack.c.bf16 %v996_v32, %v995_v14 }
 0xe25   :  { %1724 = vmatprep.subr.bf16.mxu0 %v2008_v7  ;;  %v1937_v62 = vpop.eup %1936 }
 0xe26   :  { %1716 = vmatprep.mubr.msk.bf16.mxu0 %vm53_vm0, %v1003_v15  ;;  %v1939_v9 = vpop.eup %1938  ;;  %v1002_v18 = vmul.f32 %v1937_v62, %v1925_v54 }
 0xe27   :  { %1717 = vmatmul.mubr.msk.bf16.vlgmr.msra.gmra.mrb[20].mxu0 %vm53_vm0, %v1004_v16  ;;  %v1941_v17 = vpop.eup %1940  ;;  %v999_v0 = vmul.f32 %v1939_v9, %v1923_v52 }
 0xe28   :  { %v1001_v19 = vmul.f32 %v1941_v17, %v1921_v50  ;;  %1725 = vmatpush3.bf16.msra.mxu0 %v1850_v22  ;;  %v1854_v17 = vld [vmem:[%s2487_s7 + $0x20] sm:$0xff]  }
 0xe29   :  { %v1943_v63 = vpop.eup %1942  ;;  %1726 = vmatprep.subr.bf16.mxu0 %v2008_v7 }
 0xe2a   :  { %v1000_v1 = vmul.f32 %v1943_v63, %v1927_v58  ;;  %v1006_v21 = vpack.c.bf16 %v1002_v18, %v1001_v19  ;;  %v1855_v63 = vld [vmem:[%s2487_s7 + $0x28] sm:$0xff]   ;;  %v1856_v18 = vld [vmem:[%s2487_s7 + $0x30] sm:$0xff]  }
 0xe2c   :  { %v1005_v20 = vpack.c.bf16 %v1000_v1, %v999_v0  ;;  %1727 = vmatpush3.bf16.msra.mxu0 %v1851_v23  ;;  %v1857_v0 = vld [vmem:[%s2487_s7 + $0x38] sm:$0xff]  }
 0xe2d   :  { %1740 = vmatprep.subr.bf16.mxu0 %v2008_v7 }
 0xe2e   :  { %1720 = vmatprep.mubr.msk.bf16.mxu0 %vm53_vm0, %v1005_v20 }
 0xe2f   :  { %1721 = vmatmul.mubr.msk.bf16.gmra.mrb[24].mxu0 %vm53_vm0, %v1006_v21 }
 0xe30   :  { %1728 = vmatprep.mubr.msk.bf16.mxu0 %vm2009_vm1, %v2008_v7 }
 0xefa   :  { %v1718_v3 = vpop.f32.mrb[20].mxu0 }
 0xefb   :  { %v1059_v24 = vpop.f32.mrb[21].mxu0 }
 0xefc   :  { %v1719_v25 = vpop.f32.mrb[22].mxu0 }
 0xefd   :  { %v1823_v26 = vpack.i.bf16 %v1719_v25, %v1718_v3  ;;  %v1062_v27 = vpop.f32.mrb[23].mxu0 }
 0xeff   :  { %1824 = vrot.lane.b32.xlu1 %v1823_v26, %s2015_s15 }
 0xf02   :  { %v1722_v29 = vpop.f32.mrb[24].mxu0 }
 0xf03   :  { %v1075_v30 = vpop.f32.mrb[25].mxu0 }
 0xf04   :  { %v1723_v31 = vpop.f32.mrb[26].mxu0 }
 0xf05   :  { %v1833_v33 = vpack.i.bf16 %v1723_v31, %v1722_v29  ;;  %v1078_v35 = vpop.f32.mrb[27].mxu0 }
 0xf06   :  { %v1828_v36 = vpack.i.bf16 %v1078_v35, %v1075_v30 }
 0xf07   :  { %1834 = vrot.lane.b32.xlu0 %v1833_v33, %s2016_s16 }
 0xf08   :  { %1829 = vrot.lane.b32.xlu1 %v1828_v36, %s2017_s17 }
 0xf71   :  { %v1825_v37 = vpop.permute.xlu1 %1824 }
 0xf72   :  { %v1827_v38 = vunpack.i.h.bf16 %v1825_v37  ;;  %v1826_v39 = vunpack.i.l.bf16 %v1825_v37 }
 0xf74   :  { %v1114_v46 = vsel %vm168_vm2, %v1059_v24, %v1826_v39  ;;  %v1115_v48 = vsel %vm168_vm2, %v1062_v27, %v1827_v38 }
 0xf79   :  { %v1835_v41 = vpop.permute.xlu0 %1834 }
 0xf7a   :  { %v1830_v42 = vpop.permute.xlu1 %1829  ;;  %v1837_v50 = vunpack.i.h.bf16 %v1835_v41  ;;  %v1836_v51 = vunpack.i.l.bf16 %v1835_v41 }
 0xf7b   :  { %v1832_v43 = vunpack.i.h.bf16 %v1830_v42  ;;  %v1831_v44 = vunpack.i.l.bf16 %v1830_v42 }
 0xf7d   :  { %v1117_v52 = vsel %vm453_vm3, %v1115_v48, %v1832_v43  ;;  %v1116_v53 = vsel %vm453_vm3, %v1114_v46, %v1831_v44 }
 0xf7e   :  { %v1119_v54 = vsel %vm456_vm4, %v1117_v52, %v1837_v50  ;;  %v1118_v55 = vsel %vm456_vm4, %v1116_v53, %v1836_v51  ;;  %v1858_v53 = vld [vmem:[%s2489_s9] sm:$0xff]  }
 0xf7f   :  { %v1120_v57 = vpack.c.bf16 %v1119_v54, %v1118_v55  ;;  %v1859_v54 = vld [vmem:[%s2489_s9 + $0x8] sm:$0xff]   ;;  %s2019_s9 = smov [#allocation4]  }
 0xf80   :  { %s1484_s23 = sshll.u32 %s2019_s9, 4  ;;  %s1485_s23 = int_to_ptr.vmem [resolvable:$true] %s1484_s23 }
 0xf81   :  { %1729 = vmatmul.mubr.msk.bf16.vlgmr.msra.gmra.mrb[28].mxu0 %vm53_vm0, %v1120_v57  ;;  %s1960_s24 = scalar_lea.vmem %s1485_s23, 512  ;;  %p1965_p1 = scmp.lt.s32.totalorder %s1485_s23, %s1485_s23 }
 0xf82   :  { %1748 = vmatprep.mubr.msk.bf16.mxu0 %vm2009_vm1, %v2008_v7  ;;  %1741 = vmatpush3.bf16.msra.mxu0 %v1854_v17  ;;  %p1961_p0 = scmp.ne.s32.totalorder %s1485_s23, %s1960_s24  ;;  %p1966_p2 = scmp.lt.s32.totalorder %s1960_s24, %s1960_s24 }
 0xf83   :  { %1742 = vmatprep.subr.bf16.mxu0 %v2008_v7 }
 0xf84   :  { %p1967_p3 = por %p1966_p2, %p1965_p1 }
 0xf86   :  { %1743 = vmatpush3.bf16.msra.mxu0 %v1855_v63  ;;  %p1968_p4 = pnand %p1967_p3, %p1961_p0 }
 0xf87   :  { %1744 = vmatprep.subr.bf16.mxu0 %v2008_v7 }
 0xf8a   :  { %1745 = vmatpush3.bf16.msra.mxu0 %v1856_v18 }
 0xf8b   :  { %1746 = vmatprep.subr.bf16.mxu0 %v2008_v7 }
 0xf8e   :  { %1747 = vmatpush3.bf16.msra.mxu0 %v1857_v0 }
0x1054   :  { %v1175_v58 = vpop.f32.mrb[28].mxu0 }
0x1055   :  { %v2392_v59 = vadd.f32 %v1175_v58, %v2284_v4  ;;  %v1730_v60 = vpop.f32.mrb[29].mxu0  ;;  %v1852_v4 = vld [vmem:[%s2486_s6 + $0x10] sm:$0xff]  }
0x1056   :  { %v1178_v61 = vpop.f32.mrb[30].mxu0  ;;  %1733 = vmatpush3.bf16.msra.mxu1 %v1852_v4 }
0x1057   :  { %v2395_v2 = vadd.f32 %v1178_v61, %v2289_v8  ;;  %v1731_v5 = vpop.f32.mrb[31].mxu0  ;;  %v1186_v6 = vmul.f32 %v2392_v59, %v2392_v59  ;;  %1734 = vmatprep.subr.bf16.mxu1 %v2008_v7  ;;  %v1853_v8 = vld [vmem:[%s2486_s6 + $0x18] sm:$0xff]  }
0x1059   :  { %v1188_v10 = vsel %vm53_vm0, %v1186_v6, 0.0  ;;  %v1187_v11 = vmul.f32 %v2395_v2, %v2395_v2 }
0x105a   :  { %1189 = vadd.xlane.f32.xlu1 %v1188_v10  ;;  %1735 = vmatpush3.bf16.msra.mxu1 %v1853_v8 }
0x105b   :  { %v1191_v13 = vsel %vm53_vm0, %v1187_v11, 0.0  ;;  %1752 = vmatprep.subr.bf16.mxu1 %v2008_v7 }
0x105c   :  { %1192 = vadd.xlane.f32.xlu0 %v1191_v13 }
0x10e7   :  { %v1190_v45 = vpop.xlane.xlu1 %1189 }
0x10e8   :  { %v1194_v34 = vmul.f32 0.03125, %v1190_v45 }
0x10e9   :  { %v1193_v12 = vpop.xlane.xlu0 %1192 }
0x10ea   :  { %v1196_v40 = vadd.f32 1e-05, %v1194_v34  ;;  %v1195_v28 = vmul.f32 0.03125, %v1193_v12 }
0x10ec   :  { %1944 = vrsqrt.f32 %v1196_v40  ;;  %v1197_v47 = vadd.f32 1e-05, %v1195_v28 }
0x10ee   :  { %1946 = vrsqrt.f32 %v1197_v47 }
0x10f6   :  { %v1945_v49 = vpop.eup %1944 }
0x10f7   :  { %v1200_v14 = vmul.f32 %v1945_v49, %v2392_v59 }
0x10f8   :  { %v1947_v32 = vpop.eup %1946 }
0x10f9   :  { %v1201_v15 = vmul.f32 %v1947_v32, %v2395_v2  ;;  %v1208_v16 = vmul.f32 %v1550_v56, %v1200_v14 }
0x10fb   :  { %v1209_v62 = vmul.f32 %v1550_v56, %v1201_v15 }
0x10fd   :  { %v1210_v9 = vpack.c.bf16 %v1209_v62, %v1208_v16 }
0x10ff   :  { %1737 = vmatmul.mubr.msk.bf16.vlgmr.msra.gmra.mrb[24].mxu1 %vm53_vm0, %v1210_v9 }
0x1100   :  { %1756 = vmatprep.mubr.msk.bf16.mxu1 %vm2009_vm1, %v2008_v7  ;;  %1753 = vmatpush3.bf16.msra.mxu1 %v1858_v53 }
0x1101   :  { %1754 = vmatprep.subr.bf16.mxu1 %v2008_v7  ;;  %v1573_v7 = vld [vmem:[%s2488_s8] ss:$0 sm:$0xff] }
0x1104   :  { %1755 = vmatpush3.bf16.msra.mxu1 %v1859_v54 }
0x11d2   :  { %v1265_v1 = vpop.f32.mrb[24].mxu1 }
0x11d3   :  { %1288 = vrot.lane.b32.xlu0 %v1265_v1, %s2018_s19  ;;  %v1738_v19 = vpop.f32.mrb[25].mxu1  ;;  %v1558_v22 = vmul.f32 -1.442695, %v1265_v1 }
0x11d4   :  { %v1268_v20 = vpop.f32.mrb[26].mxu1 }
0x11d5   :  { %1290 = vrot.lane.b32.xlu1 %v1268_v20, %s2018_s19  ;;  %v1739_v21 = vpop.f32.mrb[27].mxu1  ;;  %v1559_v3 = vmul.f32 -1.442695, %v1268_v20  ;;  %1948 = vpow2.f32 %v1558_v22 }
0x11d7   :  { %1950 = vpow2.f32 %v1559_v3 }
0x11df   :  { %v1949_v23 = vpop.eup %1948 }
0x11e0   :  { %v1278_v25 = vadd.f32 1.0, %v1949_v23 }
0x11e1   :  { %v1951_v24 = vpop.eup %1950 }
0x11e2   :  { %v1279_v26 = vadd.f32 1.0, %v1951_v24  ;;  %1952 = vrcp.f32 %v1278_v25 }
0x11e4   :  { %1954 = vrcp.f32 %v1279_v26 }
0x11ec   :  { %v1953_v27 = vpop.eup %1952 }
0x11ed   :  { %v1284_v31 = vmul.f32 %v1953_v27, %v1265_v1 }
0x11ee   :  { %v1955_v29 = vpop.eup %1954 }
0x11ef   :  { %v1285_v33 = vmul.f32 %v1955_v29, %v1268_v20 }
0x1245   :  { %v1289_v30 = vpop.permute.xlu0 %1288 }
0x1246   :  { %v1294_v36 = vmul.f32 %v1289_v30, %v1284_v31 }
0x1247   :  { %v1291_v35 = vpop.permute.xlu1 %1290 }
0x1248   :  { %v1295_v37 = vmul.f32 %v1291_v35, %v1285_v33 }
0x124a   :  { %v1296_v38 = vpack.c.bf16 %v1295_v37, %v1294_v36 }
0x124c   :  { %1749 = vmatmul.mubr.msk.bf16.vlgmr.msra.gmra.mrb[32].mxu0 %vm665_vm5, %v1296_v38 }
0x131f   :  { %v1367_v39 = vpop.f32.mrb[32].mxu0 }
0x1320   :  { %v1374_v41 = vadd.f32 %v1367_v39, %v2392_v59  ;;  %v1750_v42 = vpop.f32.mrb[33].mxu0 }
0x1321   :  { %v1370_v43 = vpop.f32.mrb[34].mxu0 }
0x1322   :  { %1377 = vst.msk [vmem:[#allocation4 + $0x10] sm:$0xff] %vm53_vm0, %v1374_v41  ;;  %v1375_v44 = vadd.f32 %v1370_v43, %v2395_v2  ;;  %v1751_v46 = vpop.f32.mrb[35].mxu0  ;;  %v1380_v48 = vmul.f32 %v1374_v41, %v1374_v41 }
0x1324   :  { %1378 = vst.msk [vmem:[#allocation4 + $0x18] sm:$0xff] %vm53_vm0, %v1375_v44  ;;  %v1382_v50 = vsel %vm53_vm0, %v1380_v48, 0.0  ;;  %v1381_v51 = vmul.f32 %v1375_v44, %v1375_v44 }
0x1325   :  { %1383 = vadd.xlane.f32.xlu1 %v1382_v50 }
0x1326   :  { %v1385_v52 = vsel %vm53_vm0, %v1381_v51, 0.0 }
0x1327   :  { %1386 = vadd.xlane.f32.xlu0 %v1385_v52 }
0x13b2   :  { %v1384_v55 = vpop.xlane.xlu1 %1383 }
0x13b3   :  { %v1388_v57 = vmul.f32 0.03125, %v1384_v55 }
0x13b4   :  { %v1387_v58 = vpop.xlane.xlu0 %1386 }
0x13b5   :  { %v1390_v59 = vadd.f32 1e-05, %v1388_v57  ;;  %v1389_v60 = vmul.f32 0.03125, %v1387_v58 }
0x13b7   :  { %1956 = vrsqrt.f32 %v1390_v59  ;;  %v1391_v61 = vadd.f32 1e-05, %v1389_v60 }
0x13b9   :  { %1958 = vrsqrt.f32 %v1391_v61 }
0x13c1   :  { %v1957_v2 = vpop.eup %1956 }
0x13c2   :  { %v1394_v5 = vmul.f32 %v1957_v2, %v1374_v41 }
0x13c3   :  { %v1959_v6 = vpop.eup %1958 }
0x13c4   :  { %v1395_v10 = vmul.f32 %v1959_v6, %v1375_v44  ;;  %v1402_v11 = vmul.f32 %v1573_v7, %v1394_v5 }
0x13c6   :  { %v1403_v13 = vmul.f32 %v1573_v7, %v1395_v10 }
0x13c8   :  { %v1404_v4 = vpack.c.bf16 %v1403_v13, %v1402_v11 }
0x13ca   :  { %1757 = vmatmul.mubr.msk.bf16.vlgmr.msra.gmra.mrb[28].mxu1 %vm53_vm0, %v1404_v4 }
0x13cb   :  { %1971 = shalt.err (!%p1968_p4)
}
0x13cc   :  { %s1972_s8 = scalar_lea.hbm %s2491_s11, 512 }
0x13cd   :  { %p1973_p5 = scmp.ne.s32.totalorder %s2491_s11, %s1972_s8  ;;  %p1976_p6 = scmp.lt.u32.totalorder %s1972_s8, %s2491_s11 }
0x13cf   :  { %p1978_p7 = pnand %p1976_p6, %p1973_p5 }
0x13d1   :  { %1981 = shalt.err (!%p1978_p7)
}
0x13d2   :  { %s2020_s29 = smov 128   ;;  %s2021_s17 = smov [#allocation2]  }
0x13d3   :  { %1490 = dma.vmem_to_hbm [thread:$0]  %s1485_s23, 512, %s2491_s11, [#allocation5], %s2020_s29, %s2020_s29, %s2015_s15  }
0x13d4   :  { %s1472_s6 = sshll.u32 %s2021_s17, 4  ;;  %s1473_s6 = int_to_ptr.vmem [resolvable:$true] %s1472_s6 }
0x13d5   :  { %s1982_s25 = scalar_lea.vmem %s1473_s6, 256  ;;  %p1987_p9 = scmp.lt.s32.totalorder %s1473_s6, %s1473_s6 }
0x13d6   :  { %p1983_p8 = scmp.ne.s32.totalorder %s1473_s6, %s1982_s25  ;;  %p1988_p10 = scmp.lt.s32.totalorder %s1982_s25, %s1982_s25 }
0x13d8   :  { %p1989_p11 = por %p1988_p10, %p1987_p9 }
0x13da   :  { %p1990_p12 = pnand %p1989_p11, %p1983_p8 }
0x149d   :  { %v1458_v8 = vpop.f32.mrb[28].mxu1 }
0x149e   :  { %1465 = vst [vmem:[#allocation2] sm:$0xff] %v1458_v8  ;;  %v1758_v45 = vpop.f32.mrb[29].mxu1 }
0x149f   :  { %v1461_v34 = vpop.f32.mrb[30].mxu1 }
0x14a0   :  { %1466 = vst [vmem:[#allocation2 + $0x8] sm:$0xff] %v1461_v34  ;;  %v1759_v12 = vpop.f32.mrb[31].mxu1 }
0x14a1   :  { %1993 = shalt.err (!%p1990_p12)
}
0x14a2   :  { %s1994_s11 = scalar_lea.hbm %s2490_s10, 256 }
0x14a3   :  { %p1995_p13 = scmp.ne.s32.totalorder %s2490_s10, %s1994_s11  ;;  %p1998_p0 = scmp.lt.u32.totalorder %s1994_s11, %s2490_s10 }
0x14a5   :  { %p2000_p1 = pnand %p1998_p0, %p1995_p13 }
0x14a7   :  { %2003 = shalt.err (!%p2000_p1)
}
0x14a8   :  { %1478 = dma.vmem_to_hbm [thread:$0]  %s1473_s6, 256, %s2490_s10, [#allocation3], %s2020_s29, %s2020_s29, %s2015_s15  }
0x14a9   :  { %2004 = dma.done.wait [#allocation3], 256  }
0x14aa   :  { %2005 = vsyncadd [#allocation3], 4294967040 }
0x14ab   :  { %2006 = dma.done.wait [#allocation5], 512  }
0x14ac   :  { %2007 = vsyncadd [#allocation5], 4294966784 }
0x14ad   :  { %1497 = vsyncpa [#allocation3], 1 }
0x14ae   :  { %1498 = vsyncpa [#allocation5], 1 }

</bundles_post_ra>
